<compile_context>
chip_gen: v7x
topology: tpu7x:2x2x1
jax: 0.10.0
libtpu: 0.0.40
codegen_flags: <defaults>
</compile_context>

<pallas_src>
import functools

import jax
import jax.numpy as jnp
from jax import lax
from jax.experimental import pallas as pl
from jax.experimental.pallas import tpu as pltpu


def _mqa_flash_kernel(xq_ref, xk_ref, xv_ref,
                      wq_ref, wk_ref, wv_ref, wo_ref, bo_ref,
                      o_ref,
                      q_sc, m_sc, l_sc, acc_sc,
                      *, num_heads: int, dim_per_head: int):
    """Grid = (batch, q-tiles, kv-tiles); kv is the innermost ("arbitrary") axis.

    xq_ref : (1, tq, E) bf16       xk_ref / xv_ref : (1, tk, E) bf16
    wq_ref : (H, E, D) bf16 (1/sqrt(D) pre-folded)
    wk_ref / wv_ref : (E, D) bf16
    wo_ref : (H, D, E) bf16        bo : (1, E) f32
    o_ref  : (1, tq, E)
    q_sc   : (H, tq, D) bf16       m_sc / l_sc : (H, tq, 1) f32
    acc_sc : (H, tq, D) f32
    """
    H, D = num_heads, dim_per_head
    ki = pl.program_id(2)

    # ---- init at the first kv tile: project Q once per (b, q-tile) ----------
    @pl.when(ki == 0)
    def _():
        xq = xq_ref[0]                                             # (tq, E) bf16
        for h in range(H):
            qh = jnp.dot(xq, wq_ref[h],
                         preferred_element_type=jnp.float32)       # (tq, D), pre-scaled
            q_sc[h] = qh.astype(jnp.bfloat16)
        m_sc[...] = jnp.full_like(m_sc, -jnp.inf)
        l_sc[...] = jnp.zeros_like(l_sc)
        acc_sc[...] = jnp.zeros_like(acc_sc)

    # ---- project the single shared K/V head for this kv tile (MQA) ----------
    k = jnp.dot(xk_ref[0], wk_ref[...],
                preferred_element_type=jnp.float32).astype(jnp.bfloat16)   # (tk, D)
    v = jnp.dot(xv_ref[0], wv_ref[...],
                preferred_element_type=jnp.float32).astype(jnp.bfloat16)   # (tk, D)

    # ---- online softmax per head (static unroll; H is small for MQA) --------
    for h in range(H):
        qh = q_sc[h]                                               # (tq, D) bf16
        # q_h @ k^T without materializing a transpose of k.
        s = lax.dot_general(qh, k, (((1,), (1,)), ((), ())),
                            preferred_element_type=jnp.float32)    # (tq, tk) f32
        m_prev = m_sc[h]                                           # (tq, 1)
        m_new = jnp.maximum(m_prev, jnp.max(s, axis=-1, keepdims=True))
        alpha = jnp.exp(m_prev - m_new)                            # (tq, 1)
        p = jnp.exp(s - m_new)                                     # (tq, tk) f32
        l_sc[h] = alpha * l_sc[h] + jnp.sum(p, axis=-1, keepdims=True)
        acc_sc[h] = alpha * acc_sc[h] + jnp.dot(
            p.astype(jnp.bfloat16), v, preferred_element_type=jnp.float32)
        m_sc[h] = m_new

    # ---- finalize at the last kv tile: normalize + fused output projection --
    @pl.when(ki == pl.num_programs(2) - 1)
    def _():
        out = jnp.broadcast_to(bo_ref[...], o_ref.shape[1:]).astype(jnp.float32)
        for h in range(H):
            oh = acc_sc[h] * pl.reciprocal(l_sc[h], approx=True)   # (tq, D) f32
            out = out + jnp.dot(oh.astype(jnp.bfloat16), wo_ref[h],
                                preferred_element_type=jnp.float32)
        o_ref[0] = out.astype(o_ref.dtype)

    # TODO(synk): optional boolean attn_mask (masked_fill with -inf before the
    # softmax) is not wired in; this implements the attn_mask=None path.


def _choose_tile(n: int, target: int) -> int:
    """Largest tile <= target that divides n (multiple of 8, or the full extent)."""
    if n <= target:
        return n
    t = (target // 8) * 8
    while t >= 8:
        if n % t == 0:
            return t
        t -= 8
    return n


def multi_query_attention(xq, xk, xv, params, *, num_heads: int,
                          q_tile: int = 256, kv_tile: int = 512):
    """params: wq (E,E), wk (D,E), wv (D,E), wo (E,E) in torch (out,in) layout; bo (E,)."""
    B, Nq, E = xq.shape
    _, Nk, _ = xk.shape
    assert E % num_heads == 0
    H = num_heads
    D = E // H
    scale = 1.0 / (float(D) ** 0.5)

    tq = _choose_tile(Nq, q_tile)
    tk = _choose_tile(Nk, kv_tile)

    # Host-side glue: bf16 MXU operands, weights pre-transposed to (in, out) and
    # pre-split per head; softmax scale folded into Wq; bias stays f32.
    xq_b = xq.astype(jnp.bfloat16)
    xk_b = xk.astype(jnp.bfloat16)
    xv_b = xv.astype(jnp.bfloat16)
    wq_h = (params["wq"].T * scale).reshape(E, H, D).transpose(1, 0, 2)  # (H, E, D)
    wq_h = wq_h.astype(jnp.bfloat16)
    wk_t = params["wk"].T.astype(jnp.bfloat16)                           # (E, D)
    wv_t = params["wv"].T.astype(jnp.bfloat16)                           # (E, D)
    wo_h = params["wo"].T.reshape(H, D, E).astype(jnp.bfloat16)          # (H, D, E)
    bo = params["bo"].reshape(1, E).astype(jnp.float32)                  # (1, E)

    kernel = functools.partial(_mqa_flash_kernel,
                               num_heads=H, dim_per_head=D)

    grid = (B, Nq // tq, Nk // tk)

    flops = 2 * B * (Nq * E * E            # Q projection
                     + 2 * Nk * E * D      # K/V projections (per q-tile pass ignored)
                     + 2 * Nq * Nk * E     # scores + attn@v across all heads
                     + Nq * E * E)         # output projection
    transcendentals = B * H * Nq * Nk
    bytes_accessed = (2 * (B * Nq * E + 2 * B * Nk * E)       # bf16 activations in
                      + 2 * (2 * E * E + 2 * E * D) + 4 * E   # weights + bias
                      + 4 * B * Nq * E)                       # output

    # VMEM budget from the tile plan (double-buffered I/O + weights + scratch),
    # with lane padding (last dim padded to >= 128) accounted for; kept well
    # below v7x's 64 MiB per-TensorCore VMEM.
    Dp = max(D, 128)
    vmem_est = (2 * 2 * (tq * E + 2 * tk * E)                  # activation tiles (bf16, x2 bufs)
                + 2 * 4 * tq * E                               # output tile (x2 bufs)
                + 2 * 2 * (2 * E * E + 2 * E * D) + 2 * 4 * E  # weights + bias (x2 bufs)
                + 2 * H * tq * Dp                              # bf16 Q scratch
                + 4 * H * tq * (Dp + 2 * 128))                 # acc + m + l (f32)
    vmem_limit = int(min(max(2 * vmem_est, 16 * 1024 * 1024), 48 * 1024 * 1024))

    return pl.pallas_call(
        kernel,
        out_shape=jax.ShapeDtypeStruct((B, Nq, E), xq.dtype),
        grid_spec=pltpu.PrefetchScalarGridSpec(
            num_scalar_prefetch=0,
            grid=grid,
            in_specs=[
                pl.BlockSpec((1, tq, E), lambda b, qi, ki: (b, qi, 0)),   # xq
                pl.BlockSpec((1, tk, E), lambda b, qi, ki: (b, ki, 0)),   # xk
                pl.BlockSpec((1, tk, E), lambda b, qi, ki: (b, ki, 0)),   # xv
                pl.BlockSpec((H, E, D), lambda b, qi, ki: (0, 0, 0)),     # wq (per head, scaled)
                pl.BlockSpec((E, D), lambda b, qi, ki: (0, 0)),           # wk
                pl.BlockSpec((E, D), lambda b, qi, ki: (0, 0)),           # wv
                pl.BlockSpec((H, D, E), lambda b, qi, ki: (0, 0, 0)),     # wo (per head)
                pl.BlockSpec((1, E), lambda b, qi, ki: (0, 0)),           # bo
            ],
            out_specs=pl.BlockSpec((1, tq, E), lambda b, qi, ki: (b, qi, 0)),
            scratch_shapes=[
                pltpu.VMEM((H, tq, D), jnp.bfloat16),               # cached scaled Q (per head)
                pltpu.VMEM((H, tq, 1), jnp.float32),                # running max m
                pltpu.VMEM((H, tq, 1), jnp.float32),                # running sum l
                pltpu.VMEM((H, tq, D), jnp.float32),                # running out acc
            ],
        ),
        compiler_params=pltpu.CompilerParams(
            dimension_semantics=("parallel", "parallel", "arbitrary"),
            vmem_limit_bytes=vmem_limit,
        ),
        cost_estimate=pl.CostEstimate(
            flops=flops,
            transcendentals=transcendentals,
            bytes_accessed=bytes_accessed,
        ),
    )(xq_b, xk_b, xv_b, wq_h, wk_t, wv_t, wo_h, bo)


def _reference(xq, xk, xv, params, *, num_heads: int):
    """Plain-JAX f32 reference mirroring the PyTorch forward (attn_mask=None)."""
    B, Nq, E = xq.shape
    D = E // num_heads
    scale = 1.0 / jnp.sqrt(jnp.float32(D))
    q = xq @ params["wq"].T                                    # (B, Nq, E)
    k = xk @ params["wk"].T                                    # (B, Nk, D)
    v = xv @ params["wv"].T                                    # (B, Nk, D)
    q = q.reshape(B, Nq, num_heads, D).transpose(0, 2, 1, 3)   # (B, H, Nq, D)
    dot = scale * jnp.einsum("bhqd,bkd->bhqk", q, k)
    attn = jax.nn.softmax(dot, axis=-1)
    out = jnp.einsum("bhqk,bkd->bhqd", attn, v)
    out = out.transpose(0, 2, 1, 3).reshape(B, Nq, E)
    return out @ params["wo"].T + params["bo"]


if __name__ == "__main__":
    B, Nq, Nk = 2, 16, 16
    E, H = 32, 4
    D = E // H

    key = jax.random.PRNGKey(0)
    k0, k1, k2, k3, k4, k5, k6, k7 = jax.random.split(key, 8)

    xq = jax.random.normal(k0, (B, Nq, E), jnp.float32)
    xk = jax.random.normal(k1, (B, Nk, E), jnp.float32)
    xv = jax.random.normal(k2, (B, Nk, E), jnp.float32)

    # Deterministic synthetic parameters (torch.nn.Linear weight layout: (out, in)).
    params = {
        "wq": 0.1 * jax.random.normal(k3, (E, E), jnp.float32),
        "wk": 0.1 * jax.random.normal(k4, (D, E), jnp.float32),
        "wv": 0.1 * jax.random.normal(k5, (D, E), jnp.float32),
        "wo": 0.1 * jax.random.normal(k6, (E, E), jnp.float32),
        "bo": 0.1 * jax.random.normal(k7, (E,), jnp.float32),
    }

    # Small tiles so the flash-style online softmax runs over multiple q/kv tiles.
    out = multi_query_attention(xq, xk, xv, params, num_heads=H,
                                q_tile=8, kv_tile=8)
    out = jax.block_until_ready(out)

    ref = _reference(xq, xk, xv, params, num_heads=H)
    assert out.shape == (B, Nq, E)
    # bf16 MXU operands + approx reciprocal -> ~1e-2..3e-2 relative tolerance.
    assert jnp.allclose(out, ref, atol=3e-2, rtol=3e-2), "mismatch vs reference"

    print("KERNEL_OK")
</pallas_src>

<mosaic_0001>
module attributes {stable_mosaic.version = 11 : i64} {
  func.func @_mqa_flash_kernel(%arg0: i32, %arg1: i32, %arg2: i32, %arg3: memref<1x8x32xbf16, #tpu.memory_space<vmem>>, %arg4: memref<1x8x32xbf16, #tpu.memory_space<vmem>>, %arg5: memref<1x8x32xbf16, #tpu.memory_space<vmem>>, %arg6: memref<4x32x8xbf16, #tpu.memory_space<vmem>>, %arg7: memref<32x8xbf16, #tpu.memory_space<vmem>>, %arg8: memref<32x8xbf16, #tpu.memory_space<vmem>>, %arg9: memref<4x8x32xbf16, #tpu.memory_space<vmem>>, %arg10: memref<1x32xf32, #tpu.memory_space<vmem>>, %arg11: memref<1x8x32xf32, #tpu.memory_space<vmem>>, %arg12: memref<4x8x8xbf16, #tpu.memory_space<vmem>>, %arg13: memref<4x8x1xf32, #tpu.memory_space<vmem>>, %arg14: memref<4x8x1xf32, #tpu.memory_space<vmem>>, %arg15: memref<4x8x8xf32, #tpu.memory_space<vmem>>) attributes {dimension_semantics = [#tpu.dimension_semantics<parallel>, #tpu.dimension_semantics<parallel>, #tpu.dimension_semantics<arbitrary>], iteration_bounds = array<i64: 2, 2, 2>, scalar_prefetch = 0 : i64, scratch_operands = 4 : i64, tpu.core_type = #tpu.core_type<tc>, window_params = [{transform_indices = @transform_0, window_bounds = array<i64: 1, 8, 32>}, {transform_indices = @transform_1, window_bounds = array<i64: 1, 8, 32>}, {transform_indices = @transform_2, window_bounds = array<i64: 1, 8, 32>}, {pipeline_mode = #tpu.pipeline_mode<synchronous>, transform_indices = @transform_3, window_bounds = array<i64: 4, 32, 8>}, {pipeline_mode = #tpu.pipeline_mode<synchronous>, transform_indices = @transform_4, window_bounds = array<i64: 32, 8>}, {pipeline_mode = #tpu.pipeline_mode<synchronous>, transform_indices = @transform_5, window_bounds = array<i64: 32, 8>}, {pipeline_mode = #tpu.pipeline_mode<synchronous>, transform_indices = @transform_6, window_bounds = array<i64: 4, 8, 32>}, {pipeline_mode = #tpu.pipeline_mode<synchronous>, transform_indices = @transform_7, window_bounds = array<i64: 1, 32>}, {transform_indices = @transform_8, window_bounds = array<i64: 1, 8, 32>}]} {
    %c0_i32 = arith.constant 0 : i32
    %0 = arith.cmpi eq, %arg2, %c0_i32 : i32
    %1 = arith.extui %0 : i1 to i32
    %c0_i32_0 = arith.constant 0 : i32
    %2 = arith.cmpi ne, %1, %c0_i32_0 : i32
    scf.if %2 {
      %c0_109 = arith.constant 0 : index
      %c0_110 = arith.constant 0 : index
      %c0_111 = arith.constant 0 : index
      %156 = vector.load %arg3[%c0_109, %c0_110, %c0_111] : memref<1x8x32xbf16, #tpu.memory_space<vmem>>, vector<1x8x32xbf16>
      %157 = vector.shape_cast %156 : vector<1x8x32xbf16> to vector<8x32xbf16>
      %c0_112 = arith.constant 0 : index
      %c0_113 = arith.constant 0 : index
      %c0_114 = arith.constant 0 : index
      %158 = vector.load %arg6[%c0_112, %c0_113, %c0_114] : memref<4x32x8xbf16, #tpu.memory_space<vmem>>, vector<1x32x8xbf16>
      %159 = vector.shape_cast %158 : vector<1x32x8xbf16> to vector<32x8xbf16>
      %cst_115 = arith.constant dense<0.000000e+00> : vector<8x8xf32>
      %160 = tpu.matmul %157, %159, %cst_115 {dimension_numbers = #tpu.dot_dimension_numbers<[1], [0], [0], [1], [0, 0, 1, 1], [], []>} : vector<8x32xbf16>, vector<32x8xbf16>, vector<8x8xf32> -> vector<8x8xf32>
      %161 = arith.truncf %160 : vector<8x8xf32> to vector<8x8xbf16>
      %c0_116 = arith.constant 0 : index
      %c0_117 = arith.constant 0 : index
      %c0_118 = arith.constant 0 : index
      %162 = vector.load %arg12[%c0_116, %c0_117, %c0_118] : memref<4x8x8xbf16, #tpu.memory_space<vmem>>, vector<1x8x8xbf16>
      %163 = vector.shape_cast %162 : vector<1x8x8xbf16> to vector<8x8xbf16>
      %164 = vector.shape_cast %161 : vector<8x8xbf16> to vector<1x8x8xbf16>
      tpu.vector_store %arg12[%c0_116, %c0_117, %c0_118], %164 {strides = array<i32>} : memref<4x8x8xbf16, #tpu.memory_space<vmem>>, vector<1x8x8xbf16>,
      %c1_119 = arith.constant 1 : index
      %c0_120 = arith.constant 0 : index
      %c0_121 = arith.constant 0 : index
      %165 = vector.load %arg6[%c1_119, %c0_120, %c0_121] : memref<4x32x8xbf16, #tpu.memory_space<vmem>>, vector<1x32x8xbf16>
      %166 = vector.shape_cast %165 : vector<1x32x8xbf16> to vector<32x8xbf16>
      %cst_122 = arith.constant dense<0.000000e+00> : vector<8x8xf32>
      %167 = tpu.matmul %157, %166, %cst_122 {dimension_numbers = #tpu.dot_dimension_numbers<[1], [0], [0], [1], [0, 0, 1, 1], [], []>} : vector<8x32xbf16>, vector<32x8xbf16>, vector<8x8xf32> -> vector<8x8xf32>
      %168 = arith.truncf %167 : vector<8x8xf32> to vector<8x8xbf16>
      %c1_123 = arith.constant 1 : index
      %c0_124 = arith.constant 0 : index
      %c0_125 = arith.constant 0 : index
      %169 = vector.load %arg12[%c1_123, %c0_124, %c0_125] : memref<4x8x8xbf16, #tpu.memory_space<vmem>>, vector<1x8x8xbf16>
      %170 = vector.shape_cast %169 : vector<1x8x8xbf16> to vector<8x8xbf16>
      %171 = vector.shape_cast %168 : vector<8x8xbf16> to vector<1x8x8xbf16>
      tpu.vector_store %arg12[%c1_123, %c0_124, %c0_125], %171 {strides = array<i32>} : memref<4x8x8xbf16, #tpu.memory_space<vmem>>, vector<1x8x8xbf16>,
      %c2_126 = arith.constant 2 : index
      %c0_127 = arith.constant 0 : index
      %c0_128 = arith.constant 0 : index
      %172 = vector.load %arg6[%c2_126, %c0_127, %c0_128] : memref<4x32x8xbf16, #tpu.memory_space<vmem>>, vector<1x32x8xbf16>
      %173 = vector.shape_cast %172 : vector<1x32x8xbf16> to vector<32x8xbf16>
      %cst_129 = arith.constant dense<0.000000e+00> : vector<8x8xf32>
      %174 = tpu.matmul %157, %173, %cst_129 {dimension_numbers = #tpu.dot_dimension_numbers<[1], [0], [0], [1], [0, 0, 1, 1], [], []>} : vector<8x32xbf16>, vector<32x8xbf16>, vector<8x8xf32> -> vector<8x8xf32>
      %175 = arith.truncf %174 : vector<8x8xf32> to vector<8x8xbf16>
      %c2_130 = arith.constant 2 : index
      %c0_131 = arith.constant 0 : index
      %c0_132 = arith.constant 0 : index
      %176 = vector.load %arg12[%c2_130, %c0_131, %c0_132] : memref<4x8x8xbf16, #tpu.memory_space<vmem>>, vector<1x8x8xbf16>
      %177 = vector.shape_cast %176 : vector<1x8x8xbf16> to vector<8x8xbf16>
      %178 = vector.shape_cast %175 : vector<8x8xbf16> to vector<1x8x8xbf16>
      tpu.vector_store %arg12[%c2_130, %c0_131, %c0_132], %178 {strides = array<i32>} : memref<4x8x8xbf16, #tpu.memory_space<vmem>>, vector<1x8x8xbf16>,
      %c3_133 = arith.constant 3 : index
      %c0_134 = arith.constant 0 : index
      %c0_135 = arith.constant 0 : index
      %179 = vector.load %arg6[%c3_133, %c0_134, %c0_135] : memref<4x32x8xbf16, #tpu.memory_space<vmem>>, vector<1x32x8xbf16>
      %180 = vector.shape_cast %179 : vector<1x32x8xbf16> to vector<32x8xbf16>
      %cst_136 = arith.constant dense<0.000000e+00> : vector<8x8xf32>
      %181 = tpu.matmul %157, %180, %cst_136 {dimension_numbers = #tpu.dot_dimension_numbers<[1], [0], [0], [1], [0, 0, 1, 1], [], []>} : vector<8x32xbf16>, vector<32x8xbf16>, vector<8x8xf32> -> vector<8x8xf32>
      %182 = arith.truncf %181 : vector<8x8xf32> to vector<8x8xbf16>
      %c3_137 = arith.constant 3 : index
      %c0_138 = arith.constant 0 : index
      %c0_139 = arith.constant 0 : index
      %183 = vector.load %arg12[%c3_137, %c0_138, %c0_139] : memref<4x8x8xbf16, #tpu.memory_space<vmem>>, vector<1x8x8xbf16>
      %184 = vector.shape_cast %183 : vector<1x8x8xbf16> to vector<8x8xbf16>
      %185 = vector.shape_cast %182 : vector<8x8xbf16> to vector<1x8x8xbf16>
      tpu.vector_store %arg12[%c3_137, %c0_138, %c0_139], %185 {strides = array<i32>} : memref<4x8x8xbf16, #tpu.memory_space<vmem>>, vector<1x8x8xbf16>,
      %cst_140 = arith.constant 0xFF800000 : f32
      %186 = vector.broadcast %cst_140 : f32 to vector<4x8x1xf32>
      %c0_141 = arith.constant 0 : index
      %c0_142 = arith.constant 0 : index
      %c0_143 = arith.constant 0 : index
      %187 = vector.load %arg13[%c0_141, %c0_142, %c0_143] : memref<4x8x1xf32, #tpu.memory_space<vmem>>, vector<4x8x1xf32>
      tpu.vector_store %arg13[%c0_141, %c0_142, %c0_143], %186 {strides = array<i32>} : memref<4x8x1xf32, #tpu.memory_space<vmem>>, vector<4x8x1xf32>,
      %cst_144 = arith.constant 0.000000e+00 : f32
      %188 = vector.broadcast %cst_144 : f32 to vector<4x8x1xf32>
      %c0_145 = arith.constant 0 : index
      %c0_146 = arith.constant 0 : index
      %c0_147 = arith.constant 0 : index
      %189 = vector.load %arg14[%c0_145, %c0_146, %c0_147] : memref<4x8x1xf32, #tpu.memory_space<vmem>>, vector<4x8x1xf32>
      tpu.vector_store %arg14[%c0_145, %c0_146, %c0_147], %188 {strides = array<i32>} : memref<4x8x1xf32, #tpu.memory_space<vmem>>, vector<4x8x1xf32>,
      %cst_148 = arith.constant 0.000000e+00 : f32
      %190 = vector.broadcast %cst_148 : f32 to vector<4x8x8xf32>
      %c0_149 = arith.constant 0 : index
      %c0_150 = arith.constant 0 : index
      %c0_151 = arith.constant 0 : index
      %191 = vector.load %arg15[%c0_149, %c0_150, %c0_151] : memref<4x8x8xf32, #tpu.memory_space<vmem>>, vector<4x8x8xf32>
      tpu.vector_store %arg15[%c0_149, %c0_150, %c0_151], %190 {strides = array<i32>} : memref<4x8x8xf32, #tpu.memory_space<vmem>>, vector<4x8x8xf32>,
    } else {
    }
    %c0 = arith.constant 0 : index
    %c0_1 = arith.constant 0 : index
    %c0_2 = arith.constant 0 : index
    %3 = vector.load %arg4[%c0, %c0_1, %c0_2] : memref<1x8x32xbf16, #tpu.memory_space<vmem>>, vector<1x8x32xbf16>
    %4 = vector.shape_cast %3 : vector<1x8x32xbf16> to vector<8x32xbf16>
    %c0_3 = arith.constant 0 : index
    %c0_4 = arith.constant 0 : index
    %5 = vector.load %arg7[%c0_3, %c0_4] : memref<32x8xbf16, #tpu.memory_space<vmem>>, vector<32x8xbf16>
    %cst = arith.constant dense<0.000000e+00> : vector<8x8xf32>
    %6 = tpu.matmul %4, %5, %cst {dimension_numbers = #tpu.dot_dimension_numbers<[1], [0], [0], [1], [0, 0, 1, 1], [], []>} : vector<8x32xbf16>, vector<32x8xbf16>, vector<8x8xf32> -> vector<8x8xf32>
    %7 = arith.truncf %6 : vector<8x8xf32> to vector<8x8xbf16>
    %c0_5 = arith.constant 0 : index
    %c0_6 = arith.constant 0 : index
    %c0_7 = arith.constant 0 : index
    %8 = vector.load %arg5[%c0_5, %c0_6, %c0_7] : memref<1x8x32xbf16, #tpu.memory_space<vmem>>, vector<1x8x32xbf16>
    %9 = vector.shape_cast %8 : vector<1x8x32xbf16> to vector<8x32xbf16>
    %c0_8 = arith.constant 0 : index
    %c0_9 = arith.constant 0 : index
    %10 = vector.load %arg8[%c0_8, %c0_9] : memref<32x8xbf16, #tpu.memory_space<vmem>>, vector<32x8xbf16>
    %cst_10 = arith.constant dense<0.000000e+00> : vector<8x8xf32>
    %11 = tpu.matmul %9, %10, %cst_10 {dimension_numbers = #tpu.dot_dimension_numbers<[1], [0], [0], [1], [0, 0, 1, 1], [], []>} : vector<8x32xbf16>, vector<32x8xbf16>, vector<8x8xf32> -> vector<8x8xf32>
    %12 = arith.truncf %11 : vector<8x8xf32> to vector<8x8xbf16>
    %c0_11 = arith.constant 0 : index
    %c0_12 = arith.constant 0 : index
    %c0_13 = arith.constant 0 : index
    %13 = vector.load %arg12[%c0_11, %c0_12, %c0_13] : memref<4x8x8xbf16, #tpu.memory_space<vmem>>, vector<1x8x8xbf16>
    %14 = vector.shape_cast %13 : vector<1x8x8xbf16> to vector<8x8xbf16>
    %cst_14 = arith.constant dense<0.000000e+00> : vector<8x8xf32>
    %15 = tpu.matmul %14, %7, %cst_14 {dimension_numbers = #tpu.dot_dimension_numbers<[1], [1], [0], [0], [0, 0, 1, 0], [], []>} : vector<8x8xbf16>, vector<8x8xbf16>, vector<8x8xf32> -> vector<8x8xf32>
    %c0_15 = arith.constant 0 : index
    %c0_16 = arith.constant 0 : index
    %c0_17 = arith.constant 0 : index
    %16 = vector.load %arg13[%c0_15, %c0_16, %c0_17] : memref<4x8x1xf32, #tpu.memory_space<vmem>>, vector<1x8x1xf32>
    %17 = vector.shape_cast %16 : vector<1x8x1xf32> to vector<8x1xf32>
    %cst_18 = arith.constant dense<0xFF800000> : vector<8xf32>
    %18 = vector.multi_reduction <maximumf>, %15, %cst_18 [1] : vector<8x8xf32> to vector<8xf32>
    %19 = vector.shape_cast %18 : vector<8xf32> to vector<8x1xf32>
    %20 = arith.maximumf %17, %19 : vector<8x1xf32>
    %21 = arith.subf %17, %20 : vector<8x1xf32>
    %22 = math.exp %21 : vector<8x1xf32>
    %23 = vector.broadcast %20 : vector<8x1xf32> to vector<8x8xf32>
    %24 = arith.subf %15, %23 : vector<8x8xf32>
    %25 = math.exp %24 : vector<8x8xf32>
    %c0_19 = arith.constant 0 : index
    %c0_20 = arith.constant 0 : index
    %c0_21 = arith.constant 0 : index
    %26 = vector.load %arg14[%c0_19, %c0_20, %c0_21] : memref<4x8x1xf32, #tpu.memory_space<vmem>>, vector<1x8x1xf32>
    %27 = vector.shape_cast %26 : vector<1x8x1xf32> to vector<8x1xf32>
    %28 = arith.mulf %22, %27 : vector<8x1xf32>
    %cst_22 = arith.constant dense<0.000000e+00> : vector<8xf32>
    %29 = vector.multi_reduction <add>, %25, %cst_22 [1] : vector<8x8xf32> to vector<8xf32>
    %30 = vector.shape_cast %29 : vector<8xf32> to vector<8x1xf32>
    %31 = arith.addf %28, %30 : vector<8x1xf32>
    %c0_23 = arith.constant 0 : index
    %c0_24 = arith.constant 0 : index
    %c0_25 = arith.constant 0 : index
    %32 = vector.load %arg14[%c0_23, %c0_24, %c0_25] : memref<4x8x1xf32, #tpu.memory_space<vmem>>, vector<1x8x1xf32>
    %33 = vector.shape_cast %32 : vector<1x8x1xf32> to vector<8x1xf32>
    %34 = vector.shape_cast %31 : vector<8x1xf32> to vector<1x8x1xf32>
    tpu.vector_store %arg14[%c0_23, %c0_24, %c0_25], %34 {strides = array<i32>} : memref<4x8x1xf32, #tpu.memory_space<vmem>>, vector<1x8x1xf32>,
    %c0_26 = arith.constant 0 : index
    %c0_27 = arith.constant 0 : index
    %c0_28 = arith.constant 0 : index
    %35 = vector.load %arg15[%c0_26, %c0_27, %c0_28] : memref<4x8x8xf32, #tpu.memory_space<vmem>>, vector<1x8x8xf32>
    %36 = vector.shape_cast %35 : vector<1x8x8xf32> to vector<8x8xf32>
    %37 = vector.broadcast %22 : vector<8x1xf32> to vector<8x8xf32>
    %38 = arith.mulf %37, %36 : vector<8x8xf32>
    %39 = arith.truncf %25 : vector<8x8xf32> to vector<8x8xbf16>
    %cst_29 = arith.constant dense<0.000000e+00> : vector<8x8xf32>
    %40 = tpu.matmul %39, %12, %cst_29 {dimension_numbers = #tpu.dot_dimension_numbers<[1], [0], [0], [1], [0, 0, 1, 1], [], []>} : vector<8x8xbf16>, vector<8x8xbf16>, vector<8x8xf32> -> vector<8x8xf32>
    %41 = arith.addf %38, %40 : vector<8x8xf32>
    %c0_30 = arith.constant 0 : index
    %c0_31 = arith.constant 0 : index
    %c0_32 = arith.constant 0 : index
    %42 = vector.load %arg15[%c0_30, %c0_31, %c0_32] : memref<4x8x8xf32, #tpu.memory_space<vmem>>, vector<1x8x8xf32>
    %43 = vector.shape_cast %42 : vector<1x8x8xf32> to vector<8x8xf32>
    %44 = vector.shape_cast %41 : vector<8x8xf32> to vector<1x8x8xf32>
    tpu.vector_store %arg15[%c0_30, %c0_31, %c0_32], %44 {strides = array<i32>} : memref<4x8x8xf32, #tpu.memory_space<vmem>>, vector<1x8x8xf32>,
    %c0_33 = arith.constant 0 : index
    %c0_34 = arith.constant 0 : index
    %c0_35 = arith.constant 0 : index
    %45 = vector.load %arg13[%c0_33, %c0_34, %c0_35] : memref<4x8x1xf32, #tpu.memory_space<vmem>>, vector<1x8x1xf32>
    %46 = vector.shape_cast %45 : vector<1x8x1xf32> to vector<8x1xf32>
    %47 = vector.shape_cast %20 : vector<8x1xf32> to vector<1x8x1xf32>
    tpu.vector_store %arg13[%c0_33, %c0_34, %c0_35], %47 {strides = array<i32>} : memref<4x8x1xf32, #tpu.memory_space<vmem>>, vector<1x8x1xf32>,
    %c1 = arith.constant 1 : index
    %c0_36 = arith.constant 0 : index
    %c0_37 = arith.constant 0 : index
    %48 = vector.load %arg12[%c1, %c0_36, %c0_37] : memref<4x8x8xbf16, #tpu.memory_space<vmem>>, vector<1x8x8xbf16>
    %49 = vector.shape_cast %48 : vector<1x8x8xbf16> to vector<8x8xbf16>
    %cst_38 = arith.constant dense<0.000000e+00> : vector<8x8xf32>
    %50 = tpu.matmul %49, %7, %cst_38 {dimension_numbers = #tpu.dot_dimension_numbers<[1], [1], [0], [0], [0, 0, 1, 0], [], []>} : vector<8x8xbf16>, vector<8x8xbf16>, vector<8x8xf32> -> vector<8x8xf32>
    %c1_39 = arith.constant 1 : index
    %c0_40 = arith.constant 0 : index
    %c0_41 = arith.constant 0 : index
    %51 = vector.load %arg13[%c1_39, %c0_40, %c0_41] : memref<4x8x1xf32, #tpu.memory_space<vmem>>, vector<1x8x1xf32>
    %52 = vector.shape_cast %51 : vector<1x8x1xf32> to vector<8x1xf32>
    %cst_42 = arith.constant dense<0xFF800000> : vector<8xf32>
    %53 = vector.multi_reduction <maximumf>, %50, %cst_42 [1] : vector<8x8xf32> to vector<8xf32>
    %54 = vector.shape_cast %53 : vector<8xf32> to vector<8x1xf32>
    %55 = arith.maximumf %52, %54 : vector<8x1xf32>
    %56 = arith.subf %52, %55 : vector<8x1xf32>
    %57 = math.exp %56 : vector<8x1xf32>
    %58 = vector.broadcast %55 : vector<8x1xf32> to vector<8x8xf32>
    %59 = arith.subf %50, %58 : vector<8x8xf32>
    %60 = math.exp %59 : vector<8x8xf32>
    %c1_43 = arith.constant 1 : index
    %c0_44 = arith.constant 0 : index
    %c0_45 = arith.constant 0 : index
    %61 = vector.load %arg14[%c1_43, %c0_44, %c0_45] : memref<4x8x1xf32, #tpu.memory_space<vmem>>, vector<1x8x1xf32>
    %62 = vector.shape_cast %61 : vector<1x8x1xf32> to vector<8x1xf32>
    %63 = arith.mulf %57, %62 : vector<8x1xf32>
    %cst_46 = arith.constant dense<0.000000e+00> : vector<8xf32>
    %64 = vector.multi_reduction <add>, %60, %cst_46 [1] : vector<8x8xf32> to vector<8xf32>
    %65 = vector.shape_cast %64 : vector<8xf32> to vector<8x1xf32>
    %66 = arith.addf %63, %65 : vector<8x1xf32>
    %c1_47 = arith.constant 1 : index
    %c0_48 = arith.constant 0 : index
    %c0_49 = arith.constant 0 : index
    %67 = vector.load %arg14[%c1_47, %c0_48, %c0_49] : memref<4x8x1xf32, #tpu.memory_space<vmem>>, vector<1x8x1xf32>
    %68 = vector.shape_cast %67 : vector<1x8x1xf32> to vector<8x1xf32>
    %69 = vector.shape_cast %66 : vector<8x1xf32> to vector<1x8x1xf32>
    tpu.vector_store %arg14[%c1_47, %c0_48, %c0_49], %69 {strides = array<i32>} : memref<4x8x1xf32, #tpu.memory_space<vmem>>, vector<1x8x1xf32>,
    %c1_50 = arith.constant 1 : index
    %c0_51 = arith.constant 0 : index
    %c0_52 = arith.constant 0 : index
    %70 = vector.load %arg15[%c1_50, %c0_51, %c0_52] : memref<4x8x8xf32, #tpu.memory_space<vmem>>, vector<1x8x8xf32>
    %71 = vector.shape_cast %70 : vector<1x8x8xf32> to vector<8x8xf32>
    %72 = vector.broadcast %57 : vector<8x1xf32> to vector<8x8xf32>
    %73 = arith.mulf %72, %71 : vector<8x8xf32>
    %74 = arith.truncf %60 : vector<8x8xf32> to vector<8x8xbf16>
    %cst_53 = arith.constant dense<0.000000e+00> : vector<8x8xf32>
    %75 = tpu.matmul %74, %12, %cst_53 {dimension_numbers = #tpu.dot_dimension_numbers<[1], [0], [0], [1], [0, 0, 1, 1], [], []>} : vector<8x8xbf16>, vector<8x8xbf16>, vector<8x8xf32> -> vector<8x8xf32>
    %76 = arith.addf %73, %75 : vector<8x8xf32>
    %c1_54 = arith.constant 1 : index
    %c0_55 = arith.constant 0 : index
    %c0_56 = arith.constant 0 : index
    %77 = vector.load %arg15[%c1_54, %c0_55, %c0_56] : memref<4x8x8xf32, #tpu.memory_space<vmem>>, vector<1x8x8xf32>
    %78 = vector.shape_cast %77 : vector<1x8x8xf32> to vector<8x8xf32>
    %79 = vector.shape_cast %76 : vector<8x8xf32> to vector<1x8x8xf32>
    tpu.vector_store %arg15[%c1_54, %c0_55, %c0_56], %79 {strides = array<i32>} : memref<4x8x8xf32, #tpu.memory_space<vmem>>, vector<1x8x8xf32>,
    %c1_57 = arith.constant 1 : index
    %c0_58 = arith.constant 0 : index
    %c0_59 = arith.constant 0 : index
    %80 = vector.load %arg13[%c1_57, %c0_58, %c0_59] : memref<4x8x1xf32, #tpu.memory_space<vmem>>, vector<1x8x1xf32>
    %81 = vector.shape_cast %80 : vector<1x8x1xf32> to vector<8x1xf32>
    %82 = vector.shape_cast %55 : vector<8x1xf32> to vector<1x8x1xf32>
    tpu.vector_store %arg13[%c1_57, %c0_58, %c0_59], %82 {strides = array<i32>} : memref<4x8x1xf32, #tpu.memory_space<vmem>>, vector<1x8x1xf32>,
    %c2 = arith.constant 2 : index
    %c0_60 = arith.constant 0 : index
    %c0_61 = arith.constant 0 : index
    %83 = vector.load %arg12[%c2, %c0_60, %c0_61] : memref<4x8x8xbf16, #tpu.memory_space<vmem>>, vector<1x8x8xbf16>
    %84 = vector.shape_cast %83 : vector<1x8x8xbf16> to vector<8x8xbf16>
    %cst_62 = arith.constant dense<0.000000e+00> : vector<8x8xf32>
    %85 = tpu.matmul %84, %7, %cst_62 {dimension_numbers = #tpu.dot_dimension_numbers<[1], [1], [0], [0], [0, 0, 1, 0], [], []>} : vector<8x8xbf16>, vector<8x8xbf16>, vector<8x8xf32> -> vector<8x8xf32>
    %c2_63 = arith.constant 2 : index
    %c0_64 = arith.constant 0 : index
    %c0_65 = arith.constant 0 : index
    %86 = vector.load %arg13[%c2_63, %c0_64, %c0_65] : memref<4x8x1xf32, #tpu.memory_space<vmem>>, vector<1x8x1xf32>
    %87 = vector.shape_cast %86 : vector<1x8x1xf32> to vector<8x1xf32>
    %cst_66 = arith.constant dense<0xFF800000> : vector<8xf32>
    %88 = vector.multi_reduction <maximumf>, %85, %cst_66 [1] : vector<8x8xf32> to vector<8xf32>
    %89 = vector.shape_cast %88 : vector<8xf32> to vector<8x1xf32>
    %90 = arith.maximumf %87, %89 : vector<8x1xf32>
    %91 = arith.subf %87, %90 : vector<8x1xf32>
    %92 = math.exp %91 : vector<8x1xf32>
    %93 = vector.broadcast %90 : vector<8x1xf32> to vector<8x8xf32>
    %94 = arith.subf %85, %93 : vector<8x8xf32>
    %95 = math.exp %94 : vector<8x8xf32>
    %c2_67 = arith.constant 2 : index
    %c0_68 = arith.constant 0 : index
    %c0_69 = arith.constant 0 : index
    %96 = vector.load %arg14[%c2_67, %c0_68, %c0_69] : memref<4x8x1xf32, #tpu.memory_space<vmem>>, vector<1x8x1xf32>
    %97 = vector.shape_cast %96 : vector<1x8x1xf32> to vector<8x1xf32>
    %98 = arith.mulf %92, %97 : vector<8x1xf32>
    %cst_70 = arith.constant dense<0.000000e+00> : vector<8xf32>
    %99 = vector.multi_reduction <add>, %95, %cst_70 [1] : vector<8x8xf32> to vector<8xf32>
    %100 = vector.shape_cast %99 : vector<8xf32> to vector<8x1xf32>
    %101 = arith.addf %98, %100 : vector<8x1xf32>
    %c2_71 = arith.constant 2 : index
    %c0_72 = arith.constant 0 : index
    %c0_73 = arith.constant 0 : index
    %102 = vector.load %arg14[%c2_71, %c0_72, %c0_73] : memref<4x8x1xf32, #tpu.memory_space<vmem>>, vector<1x8x1xf32>
    %103 = vector.shape_cast %102 : vector<1x8x1xf32> to vector<8x1xf32>
    %104 = vector.shape_cast %101 : vector<8x1xf32> to vector<1x8x1xf32>
    tpu.vector_store %arg14[%c2_71, %c0_72, %c0_73], %104 {strides = array<i32>} : memref<4x8x1xf32, #tpu.memory_space<vmem>>, vector<1x8x1xf32>,
    %c2_74 = arith.constant 2 : index
    %c0_75 = arith.constant 0 : index
    %c0_76 = arith.constant 0 : index
    %105 = vector.load %arg15[%c2_74, %c0_75, %c0_76] : memref<4x8x8xf32, #tpu.memory_space<vmem>>, vector<1x8x8xf32>
    %106 = vector.shape_cast %105 : vector<1x8x8xf32> to vector<8x8xf32>
    %107 = vector.broadcast %92 : vector<8x1xf32> to vector<8x8xf32>
    %108 = arith.mulf %107, %106 : vector<8x8xf32>
    %109 = arith.truncf %95 : vector<8x8xf32> to vector<8x8xbf16>
    %cst_77 = arith.constant dense<0.000000e+00> : vector<8x8xf32>
    %110 = tpu.matmul %109, %12, %cst_77 {dimension_numbers = #tpu.dot_dimension_numbers<[1], [0], [0], [1], [0, 0, 1, 1], [], []>} : vector<8x8xbf16>, vector<8x8xbf16>, vector<8x8xf32> -> vector<8x8xf32>
    %111 = arith.addf %108, %110 : vector<8x8xf32>
    %c2_78 = arith.constant 2 : index
    %c0_79 = arith.constant 0 : index
    %c0_80 = arith.constant 0 : index
    %112 = vector.load %arg15[%c2_78, %c0_79, %c0_80] : memref<4x8x8xf32, #tpu.memory_space<vmem>>, vector<1x8x8xf32>
    %113 = vector.shape_cast %112 : vector<1x8x8xf32> to vector<8x8xf32>
    %114 = vector.shape_cast %111 : vector<8x8xf32> to vector<1x8x8xf32>
    tpu.vector_store %arg15[%c2_78, %c0_79, %c0_80], %114 {strides = array<i32>} : memref<4x8x8xf32, #tpu.memory_space<vmem>>, vector<1x8x8xf32>,
    %c2_81 = arith.constant 2 : index
    %c0_82 = arith.constant 0 : index
    %c0_83 = arith.constant 0 : index
    %115 = vector.load %arg13[%c2_81, %c0_82, %c0_83] : memref<4x8x1xf32, #tpu.memory_space<vmem>>, vector<1x8x1xf32>
    %116 = vector.shape_cast %115 : vector<1x8x1xf32> to vector<8x1xf32>
    %117 = vector.shape_cast %90 : vector<8x1xf32> to vector<1x8x1xf32>
    tpu.vector_store %arg13[%c2_81, %c0_82, %c0_83], %117 {strides = array<i32>} : memref<4x8x1xf32, #tpu.memory_space<vmem>>, vector<1x8x1xf32>,
    %c3 = arith.constant 3 : index
    %c0_84 = arith.constant 0 : index
    %c0_85 = arith.constant 0 : index
    %118 = vector.load %arg12[%c3, %c0_84, %c0_85] : memref<4x8x8xbf16, #tpu.memory_space<vmem>>, vector<1x8x8xbf16>
    %119 = vector.shape_cast %118 : vector<1x8x8xbf16> to vector<8x8xbf16>
    %cst_86 = arith.constant dense<0.000000e+00> : vector<8x8xf32>
    %120 = tpu.matmul %119, %7, %cst_86 {dimension_numbers = #tpu.dot_dimension_numbers<[1], [1], [0], [0], [0, 0, 1, 0], [], []>} : vector<8x8xbf16>, vector<8x8xbf16>, vector<8x8xf32> -> vector<8x8xf32>
    %c3_87 = arith.constant 3 : index
    %c0_88 = arith.constant 0 : index
    %c0_89 = arith.constant 0 : index
    %121 = vector.load %arg13[%c3_87, %c0_88, %c0_89] : memref<4x8x1xf32, #tpu.memory_space<vmem>>, vector<1x8x1xf32>
    %122 = vector.shape_cast %121 : vector<1x8x1xf32> to vector<8x1xf32>
    %cst_90 = arith.constant dense<0xFF800000> : vector<8xf32>
    %123 = vector.multi_reduction <maximumf>, %120, %cst_90 [1] : vector<8x8xf32> to vector<8xf32>
    %124 = vector.shape_cast %123 : vector<8xf32> to vector<8x1xf32>
    %125 = arith.maximumf %122, %124 : vector<8x1xf32>
    %126 = arith.subf %122, %125 : vector<8x1xf32>
    %127 = math.exp %126 : vector<8x1xf32>
    %128 = vector.broadcast %125 : vector<8x1xf32> to vector<8x8xf32>
    %129 = arith.subf %120, %128 : vector<8x8xf32>
    %130 = math.exp %129 : vector<8x8xf32>
    %c3_91 = arith.constant 3 : index
    %c0_92 = arith.constant 0 : index
    %c0_93 = arith.constant 0 : index
    %131 = vector.load %arg14[%c3_91, %c0_92, %c0_93] : memref<4x8x1xf32, #tpu.memory_space<vmem>>, vector<1x8x1xf32>
    %132 = vector.shape_cast %131 : vector<1x8x1xf32> to vector<8x1xf32>
    %133 = arith.mulf %127, %132 : vector<8x1xf32>
    %cst_94 = arith.constant dense<0.000000e+00> : vector<8xf32>
    %134 = vector.multi_reduction <add>, %130, %cst_94 [1] : vector<8x8xf32> to vector<8xf32>
    %135 = vector.shape_cast %134 : vector<8xf32> to vector<8x1xf32>
    %136 = arith.addf %133, %135 : vector<8x1xf32>
    %c3_95 = arith.constant 3 : index
    %c0_96 = arith.constant 0 : index
    %c0_97 = arith.constant 0 : index
    %137 = vector.load %arg14[%c3_95, %c0_96, %c0_97] : memref<4x8x1xf32, #tpu.memory_space<vmem>>, vector<1x8x1xf32>
    %138 = vector.shape_cast %137 : vector<1x8x1xf32> to vector<8x1xf32>
    %139 = vector.shape_cast %136 : vector<8x1xf32> to vector<1x8x1xf32>
    tpu.vector_store %arg14[%c3_95, %c0_96, %c0_97], %139 {strides = array<i32>} : memref<4x8x1xf32, #tpu.memory_space<vmem>>, vector<1x8x1xf32>,
    %c3_98 = arith.constant 3 : index
    %c0_99 = arith.constant 0 : index
    %c0_100 = arith.constant 0 : index
    %140 = vector.load %arg15[%c3_98, %c0_99, %c0_100] : memref<4x8x8xf32, #tpu.memory_space<vmem>>, vector<1x8x8xf32>
    %141 = vector.shape_cast %140 : vector<1x8x8xf32> to vector<8x8xf32>
    %142 = vector.broadcast %127 : vector<8x1xf32> to vector<8x8xf32>
    %143 = arith.mulf %142, %141 : vector<8x8xf32>
    %144 = arith.truncf %130 : vector<8x8xf32> to vector<8x8xbf16>
    %cst_101 = arith.constant dense<0.000000e+00> : vector<8x8xf32>
    %145 = tpu.matmul %144, %12, %cst_101 {dimension_numbers = #tpu.dot_dimension_numbers<[1], [0], [0], [1], [0, 0, 1, 1], [], []>} : vector<8x8xbf16>, vector<8x8xbf16>, vector<8x8xf32> -> vector<8x8xf32>
    %146 = arith.addf %143, %145 : vector<8x8xf32>
    %c3_102 = arith.constant 3 : index
    %c0_103 = arith.constant 0 : index
    %c0_104 = arith.constant 0 : index
    %147 = vector.load %arg15[%c3_102, %c0_103, %c0_104] : memref<4x8x8xf32, #tpu.memory_space<vmem>>, vector<1x8x8xf32>
    %148 = vector.shape_cast %147 : vector<1x8x8xf32> to vector<8x8xf32>
    %149 = vector.shape_cast %146 : vector<8x8xf32> to vector<1x8x8xf32>
    tpu.vector_store %arg15[%c3_102, %c0_103, %c0_104], %149 {strides = array<i32>} : memref<4x8x8xf32, #tpu.memory_space<vmem>>, vector<1x8x8xf32>,
    %c3_105 = arith.constant 3 : index
    %c0_106 = arith.constant 0 : index
    %c0_107 = arith.constant 0 : index
    %150 = vector.load %arg13[%c3_105, %c0_106, %c0_107] : memref<4x8x1xf32, #tpu.memory_space<vmem>>, vector<1x8x1xf32>
    %151 = vector.shape_cast %150 : vector<1x8x1xf32> to vector<8x1xf32>
    %152 = vector.shape_cast %125 : vector<8x1xf32> to vector<1x8x1xf32>
    tpu.vector_store %arg13[%c3_105, %c0_106, %c0_107], %152 {strides = array<i32>} : memref<4x8x1xf32, #tpu.memory_space<vmem>>, vector<1x8x1xf32>,
    %c1_i32 = arith.constant 1 : i32
    %153 = arith.cmpi eq, %arg2, %c1_i32 : i32
    %154 = arith.extui %153 : i1 to i32
    %c0_i32_108 = arith.constant 0 : i32
    %155 = arith.cmpi ne, %154, %c0_i32_108 : i32
    scf.if %155 {
      %c0_109 = arith.constant 0 : index
      %c0_110 = arith.constant 0 : index
      %156 = vector.load %arg10[%c0_109, %c0_110] : memref<1x32xf32, #tpu.memory_space<vmem>>, vector<1x32xf32>
      %157 = vector.shape_cast %156 : vector<1x32xf32> to vector<1x32xf32>
      %158 = vector.broadcast %157 : vector<1x32xf32> to vector<8x32xf32>
      %c0_111 = arith.constant 0 : index
      %c0_112 = arith.constant 0 : index
      %c0_113 = arith.constant 0 : index
      %159 = vector.load %arg15[%c0_111, %c0_112, %c0_113] : memref<4x8x8xf32, #tpu.memory_space<vmem>>, vector<1x8x8xf32>
      %160 = vector.shape_cast %159 : vector<1x8x8xf32> to vector<8x8xf32>
      %c0_114 = arith.constant 0 : index
      %c0_115 = arith.constant 0 : index
      %c0_116 = arith.constant 0 : index
      %161 = vector.load %arg14[%c0_114, %c0_115, %c0_116] : memref<4x8x1xf32, #tpu.memory_space<vmem>>, vector<1x8x1xf32>
      %162 = vector.shape_cast %161 : vector<1x8x1xf32> to vector<8x1xf32>
      %163 = tpu.reciprocal %162 {approx = true} : vector<8x1xf32> -> vector<8x1xf32>
      %164 = vector.broadcast %163 : vector<8x1xf32> to vector<8x8xf32>
      %165 = arith.mulf %160, %164 : vector<8x8xf32>
      %166 = arith.truncf %165 : vector<8x8xf32> to vector<8x8xbf16>
      %c0_117 = arith.constant 0 : index
      %c0_118 = arith.constant 0 : index
      %c0_119 = arith.constant 0 : index
      %167 = vector.load %arg9[%c0_117, %c0_118, %c0_119] : memref<4x8x32xbf16, #tpu.memory_space<vmem>>, vector<1x8x32xbf16>
      %168 = vector.shape_cast %167 : vector<1x8x32xbf16> to vector<8x32xbf16>
      %cst_120 = arith.constant dense<0.000000e+00> : vector<8x32xf32>
      %169 = tpu.matmul %166, %168, %cst_120 {dimension_numbers = #tpu.dot_dimension_numbers<[1], [0], [0], [1], [0, 0, 1, 1], [], []>} : vector<8x8xbf16>, vector<8x32xbf16>, vector<8x32xf32> -> vector<8x32xf32>
      %170 = arith.addf %158, %169 : vector<8x32xf32>
      %c1_121 = arith.constant 1 : index
      %c0_122 = arith.constant 0 : index
      %c0_123 = arith.constant 0 : index
      %171 = vector.load %arg15[%c1_121, %c0_122, %c0_123] : memref<4x8x8xf32, #tpu.memory_space<vmem>>, vector<1x8x8xf32>
      %172 = vector.shape_cast %171 : vector<1x8x8xf32> to vector<8x8xf32>
      %c1_124 = arith.constant 1 : index
      %c0_125 = arith.constant 0 : index
      %c0_126 = arith.constant 0 : index
      %173 = vector.load %arg14[%c1_124, %c0_125, %c0_126] : memref<4x8x1xf32, #tpu.memory_space<vmem>>, vector<1x8x1xf32>
      %174 = vector.shape_cast %173 : vector<1x8x1xf32> to vector<8x1xf32>
      %175 = tpu.reciprocal %174 {approx = true} : vector<8x1xf32> -> vector<8x1xf32>
      %176 = vector.broadcast %175 : vector<8x1xf32> to vector<8x8xf32>
      %177 = arith.mulf %172, %176 : vector<8x8xf32>
      %178 = arith.truncf %177 : vector<8x8xf32> to vector<8x8xbf16>
      %c1_127 = arith.constant 1 : index
      %c0_128 = arith.constant 0 : index
      %c0_129 = arith.constant 0 : index
      %179 = vector.load %arg9[%c1_127, %c0_128, %c0_129] : memref<4x8x32xbf16, #tpu.memory_space<vmem>>, vector<1x8x32xbf16>
      %180 = vector.shape_cast %179 : vector<1x8x32xbf16> to vector<8x32xbf16>
      %cst_130 = arith.constant dense<0.000000e+00> : vector<8x32xf32>
      %181 = tpu.matmul %178, %180, %cst_130 {dimension_numbers = #tpu.dot_dimension_numbers<[1], [0], [0], [1], [0, 0, 1, 1], [], []>} : vector<8x8xbf16>, vector<8x32xbf16>, vector<8x32xf32> -> vector<8x32xf32>
      %182 = arith.addf %170, %181 : vector<8x32xf32>
      %c2_131 = arith.constant 2 : index
      %c0_132 = arith.constant 0 : index
      %c0_133 = arith.constant 0 : index
      %183 = vector.load %arg15[%c2_131, %c0_132, %c0_133] : memref<4x8x8xf32, #tpu.memory_space<vmem>>, vector<1x8x8xf32>
      %184 = vector.shape_cast %183 : vector<1x8x8xf32> to vector<8x8xf32>
      %c2_134 = arith.constant 2 : index
      %c0_135 = arith.constant 0 : index
      %c0_136 = arith.constant 0 : index
      %185 = vector.load %arg14[%c2_134, %c0_135, %c0_136] : memref<4x8x1xf32, #tpu.memory_space<vmem>>, vector<1x8x1xf32>
      %186 = vector.shape_cast %185 : vector<1x8x1xf32> to vector<8x1xf32>
      %187 = tpu.reciprocal %186 {approx = true} : vector<8x1xf32> -> vector<8x1xf32>
      %188 = vector.broadcast %187 : vector<8x1xf32> to vector<8x8xf32>
      %189 = arith.mulf %184, %188 : vector<8x8xf32>
      %190 = arith.truncf %189 : vector<8x8xf32> to vector<8x8xbf16>
      %c2_137 = arith.constant 2 : index
      %c0_138 = arith.constant 0 : index
      %c0_139 = arith.constant 0 : index
      %191 = vector.load %arg9[%c2_137, %c0_138, %c0_139] : memref<4x8x32xbf16, #tpu.memory_space<vmem>>, vector<1x8x32xbf16>
      %192 = vector.shape_cast %191 : vector<1x8x32xbf16> to vector<8x32xbf16>
      %cst_140 = arith.constant dense<0.000000e+00> : vector<8x32xf32>
      %193 = tpu.matmul %190, %192, %cst_140 {dimension_numbers = #tpu.dot_dimension_numbers<[1], [0], [0], [1], [0, 0, 1, 1], [], []>} : vector<8x8xbf16>, vector<8x32xbf16>, vector<8x32xf32> -> vector<8x32xf32>
      %194 = arith.addf %182, %193 : vector<8x32xf32>
      %c3_141 = arith.constant 3 : index
      %c0_142 = arith.constant 0 : index
      %c0_143 = arith.constant 0 : index
      %195 = vector.load %arg15[%c3_141, %c0_142, %c0_143] : memref<4x8x8xf32, #tpu.memory_space<vmem>>, vector<1x8x8xf32>
      %196 = vector.shape_cast %195 : vector<1x8x8xf32> to vector<8x8xf32>
      %c3_144 = arith.constant 3 : index
      %c0_145 = arith.constant 0 : index
      %c0_146 = arith.constant 0 : index
      %197 = vector.load %arg14[%c3_144, %c0_145, %c0_146] : memref<4x8x1xf32, #tpu.memory_space<vmem>>, vector<1x8x1xf32>
      %198 = vector.shape_cast %197 : vector<1x8x1xf32> to vector<8x1xf32>
      %199 = tpu.reciprocal %198 {approx = true} : vector<8x1xf32> -> vector<8x1xf32>
      %200 = vector.broadcast %199 : vector<8x1xf32> to vector<8x8xf32>
      %201 = arith.mulf %196, %200 : vector<8x8xf32>
      %202 = arith.truncf %201 : vector<8x8xf32> to vector<8x8xbf16>
      %c3_147 = arith.constant 3 : index
      %c0_148 = arith.constant 0 : index
      %c0_149 = arith.constant 0 : index
      %203 = vector.load %arg9[%c3_147, %c0_148, %c0_149] : memref<4x8x32xbf16, #tpu.memory_space<vmem>>, vector<1x8x32xbf16>
      %204 = vector.shape_cast %203 : vector<1x8x32xbf16> to vector<8x32xbf16>
      %cst_150 = arith.constant dense<0.000000e+00> : vector<8x32xf32>
      %205 = tpu.matmul %202, %204, %cst_150 {dimension_numbers = #tpu.dot_dimension_numbers<[1], [0], [0], [1], [0, 0, 1, 1], [], []>} : vector<8x8xbf16>, vector<8x32xbf16>, vector<8x32xf32> -> vector<8x32xf32>
      %206 = arith.addf %194, %205 : vector<8x32xf32>
      %c0_151 = arith.constant 0 : index
      %c0_152 = arith.constant 0 : index
      %c0_153 = arith.constant 0 : index
      %207 = vector.load %arg11[%c0_151, %c0_152, %c0_153] : memref<1x8x32xf32, #tpu.memory_space<vmem>>, vector<1x8x32xf32>
      %208 = vector.shape_cast %207 : vector<1x8x32xf32> to vector<8x32xf32>
      %209 = vector.shape_cast %206 : vector<8x32xf32> to vector<1x8x32xf32>
      tpu.vector_store %arg11[%c0_151, %c0_152, %c0_153], %209 {strides = array<i32>} : memref<1x8x32xf32, #tpu.memory_space<vmem>>, vector<1x8x32xf32>,
    } else {
    }
    return
  }
  func.func @transform_0(%arg0: i32, %arg1: i32, %arg2: i32) -> (i32, i32, i32) {
    %c0_i32 = arith.constant 0 : i32
    %c0_i32_0 = arith.constant 0 : i32
    return %arg0, %arg1, %c0_i32 : i32, i32, i32
  }
  func.func @transform_1(%arg0: i32, %arg1: i32, %arg2: i32) -> (i32, i32, i32) {
    %c0_i32 = arith.constant 0 : i32
    %c0_i32_0 = arith.constant 0 : i32
    return %arg0, %arg2, %c0_i32 : i32, i32, i32
  }
  func.func @transform_2(%arg0: i32, %arg1: i32, %arg2: i32) -> (i32, i32, i32) {
    %c0_i32 = arith.constant 0 : i32
    %c0_i32_0 = arith.constant 0 : i32
    return %arg0, %arg2, %c0_i32 : i32, i32, i32
  }
  func.func @transform_3(%arg0: i32, %arg1: i32, %arg2: i32) -> (i32, i32, i32) {
    %c0_i32 = arith.constant 0 : i32
    %c0_i32_0 = arith.constant 0 : i32
    %c0_i32_1 = arith.constant 0 : i32
    %c0_i32_2 = arith.constant 0 : i32
    return %c0_i32, %c0_i32_0, %c0_i32_1 : i32, i32, i32
  }
  func.func @transform_4(%arg0: i32, %arg1: i32, %arg2: i32) -> (i32, i32) {
    %c0_i32 = arith.constant 0 : i32
    %c0_i32_0 = arith.constant 0 : i32
    %c0_i32_1 = arith.constant 0 : i32
    return %c0_i32, %c0_i32_0 : i32, i32
  }
  func.func @transform_5(%arg0: i32, %arg1: i32, %arg2: i32) -> (i32, i32) {
    %c0_i32 = arith.constant 0 : i32
    %c0_i32_0 = arith.constant 0 : i32
    %c0_i32_1 = arith.constant 0 : i32
    return %c0_i32, %c0_i32_0 : i32, i32
  }
  func.func @transform_6(%arg0: i32, %arg1: i32, %arg2: i32) -> (i32, i32, i32) {
    %c0_i32 = arith.constant 0 : i32
    %c0_i32_0 = arith.constant 0 : i32
    %c0_i32_1 = arith.constant 0 : i32
    %c0_i32_2 = arith.constant 0 : i32
    return %c0_i32, %c0_i32_0, %c0_i32_1 : i32, i32, i32
  }
  func.func @transform_7(%arg0: i32, %arg1: i32, %arg2: i32) -> (i32, i32) {
    %c0_i32 = arith.constant 0 : i32
    %c0_i32_0 = arith.constant 0 : i32
    %c0_i32_1 = arith.constant 0 : i32
    return %c0_i32, %c0_i32_0 : i32, i32
  }
  func.func @transform_8(%arg0: i32, %arg1: i32, %arg2: i32) -> (i32, i32, i32) {
    %c0_i32 = arith.constant 0 : i32
    %c0_i32_0 = arith.constant 0 : i32
    return %arg0, %arg1, %c0_i32 : i32, i32, i32
  }
}

</mosaic_0001>

<bundles_post_ra>
// kernel: tpu_custom_call.1
= control target key start
LH: loop header
LB: loop body
LE: loop exit
PB: predicated region body
PF: predicated region fallthrough
CT: control target
= control target key end

     0   :  { %13 = vsyncpa [#allocation7], 0  ;;  %s2562_s0 = inlined_call_operand.vmem [shape: bf16[2,16,32], index: 0, kind: input, shape index: {}]   ;;  %s2563_s1 = inlined_call_operand.vmem [shape: bf16[2,16,32], index: 1, kind: input, shape index: {}]   ;;  %s2564_s2 = inlined_call_operand.vmem [shape: bf16[2,16,32], index: 2, kind: input, shape index: {}]   ;;  %s2565_s3 = inlined_call_operand.vmem [shape: bf16[4,32,8], index: 3, kind: input, shape index: {}]   ;;  %s2566_s4 = inlined_call_operand.vmem [shape: bf16[32,8], index: 4, kind: input, shape index: {}]   ;;  %s2567_s5 = inlined_call_operand.vmem [shape: bf16[32,8], index: 5, kind: input, shape index: {}]   ;;  %s2568_s6 = inlined_call_operand.vmem [shape: bf16[4,8,32], index: 6, kind: input, shape index: {}]   ;;  %s2569_s7 = inlined_call_operand.vmem [shape: f32[1,32], index: 7, kind: input, shape index: {}]   ;;  %s2570_s8 = inlined_call_operand.hbm [shape: f32[2,16,32], index: 8, kind: output, shape index: {}]  }
   0x1   :  { %15 = vsyncpa [#allocation7 + $0x1], 0  ;;  %s2212_s27 = smov 0   ;;  %s2214_s28 = smov 0  }
   0x2   :  { %s2216_s29 = smov 0   ;;  %s2218_s30 = smov 0  }
   0x3   :  { %s2220_s9 = smov 0   ;;  %s2222_s10 = smov 0  }
   0x4   :  { %s2224_s11 = smov 0   ;;  %s2226_s12 = smov 0  }
   0x5   :  { %s2228_s13 = smov 0   ;;  %s2230_s14 = smov 0  }
   0x6 LB: > { %2582 = sst [smem:[#allocation9_spill]] %s2119_s27  ;;  %s1672_s15 = sadd.s32 4294967295, %s2155_s14   ;;  %s2155_s14 = sphi %s2230_s14, %s21_s14   ;;  %s2151_s13 = sphi %s2228_s13, %s2606_s13   ;;  %s2147_s12 = sphi %s2226_s12, %s2605_s12   ;;  %s2143_s11 = sphi %s2224_s11, %s2604_s11   ;;  %s2139_s10 = sphi %s2222_s10, %s2603_s10   ;;  %s2135_s9 = sphi %s2220_s9, %s2602_s9   ;;  %s2131_s30 = sphi %s2218_s30, %s2601_s30   ;;  %s2127_s29 = sphi %s2216_s29, %s2600_s29   ;;  %s2123_s28 = sphi %s2214_s28, %s2608_s28   ;;  %s2119_s27 = sphi %s2212_s27, %s2607_s27  }
   0x7   : > { %2583 = sst [smem:[#allocation10_spill]] %s2127_s29  ;;  %s1673_s16 = sadd.s32 4294967294, %s2155_s14  }
   0x8   : > { %2584 = sst [smem:[#allocation11_spill]] %s2143_s11  ;;  %s33_s17 = sadd.s32 1, %s2143_s11 }
   0x9   : > { %2585 = sst [smem:[#allocation12_spill]] %s2147_s12  ;;  %p34_p0 = scmp.ge.s32.totalorder %s33_s17, 2 }
   0xa   : > { %2586 = sst [smem:[#allocation13_spill]] %s2151_s13  ;;  %s36_s18 = sadd.s32 1, %s2147_s12 }
   0xb   : > { %2587 = sst [smem:[#allocation14_spill]] %s2155_s14  ;;  %s40_s19 = sadd.s32 1, %s2151_s13 }
   0xc   : > { %p248_p1 = scmp.ne.s32.totalorder %s2127_s29, %s2123_s28  ;;  %s2610_s17 = smov (%p34_p0, %s33_s17), 0 }
   0xd   : > { %2588 = sst [smem:[#allocation15_spill]] %s2610_s17  ;;  %s2612_s18 = smov (!%p34_p0, %s36_s18), %s2147_s12 }
   0xe   : > { %p249_p2 = scmp.eq.s32.totalorder %s1672_s15, 7  ;;  %p254_p3 = scmp.ne.s32.totalorder %s2123_s28, %s2119_s27 }
   0xf   : > { %p38_p4 = scmp.ge.s32.totalorder %s2612_s18, 2  ;;  %p255_p5 = scmp.eq.s32.totalorder %s1673_s16, 7 }
  0x10   : > { %p2274_p6 = por %p249_p2, %p248_p1  ;;  %p1676_p8 = scmp.ge.s32.totalorder %s2155_s14, 1 }
  0x11   : > { %s2614_s18 = smov (%p38_p4, %s2612_s18), 0  ;;  %s2616_s19 = smov (!%p38_p4, %s40_s19), %s2151_s13 }
  0x12   : > { %2590 = sst [smem:[#allocation16_spill]] %s2614_s18  ;;  %p2281_p7 = por %p255_p5, %p254_p3 }
  0x13   : > { %p42_p9 = scmp.ge.s32.totalorder %s2616_s19, 2  ;;  %p321_p10 = scmp.lt.s32.totalorder %s2155_s14, 9 }
  0x14   : > { %s2591_s21 = scalar_select %p2281_p7, 1, 0 }
  0x15   : > { %s234_s22 = ssub.s32 %s2147_s12, %s2614_s18  ;;  %s2618_s19 = smov (%p42_p9, %s2616_s19), 0 }
  0x16   : > { %2592 = sst [smem:[#allocation17_spill]] %s2591_s21  ;;  %p322_p11 = pnand %p1676_p8, %p321_p10 }
  0x17   : > { %2593 = sst [smem:[#allocation18_spill]] %s2618_s19  ;;  %s233_s23 = ssub.s32 %s2151_s13, %s2618_s19 }
  0x18   : > { %s235_s24 = sor.u32 %s234_s22, %s233_s23  ;;  %s238_s25 = sadd.s32 1, %s2127_s29 }
  0x19   : > { %p236_p12 = scmp.eq.s32.totalorder %s235_s24, 0  ;;  %325 = sbr.rel (%p322_p11) target bundleno = 1563 (0x61b), region = 52 }
  0x1a   : > { %s2578_s15 = sand.u32 (!%p322_p11), 1, %s2123_s28   ;;  %p374_p13 = scmp.lt.s32.totalorder (!%p322_p11), %s2139_s10, 1 }
  0x1b   : > { %s2295_s26 = scalar_select %p236_p12, %s2127_s29, %s238_s25  }
  0x1c   : > { %s2301_s16 = sshll.u32 (!%p322_p11), %s2578_s15, 3  ;;  %p376_p0 = scmp.lt.s32.totalorder (!%p322_p11), %s2135_s9, 1 }
  0x1d   : > { %2594 = sst [smem:[#allocation19_spill]] %s2295_s26  ;;  %p384_p1 = scmp.lt.s32.totalorder (!%p322_p11), %s2131_s30, 1 }
  0x1e   : > { %p1684_p2 = scmp.ne.s32.totalorder (!%p322_p11), %s2131_s30, 0 }
  0x20   : > { %s375_s22 = scalar_select %p374_p13, %s2139_s10, 1 }
  0x21   : > { %s377_s23 = scalar_select %p376_p0, %s2135_s9, 1 }
  0x22   : > { %s1678_s24 = sshll.u32 %s375_s22, 1  ;;  %vm647_vm0 = vcmask (!%p1684_p2), 7168   ;;  %vm656_vm1 = vcmask (!%p1684_p2), 64512   ;;  %v2157_v0 = vmov (!%p1684_p2), 0.0   ;;  %v2158_v1 = vmov (!%p1684_p2), -inf   ;;  %v2005_v2 = vld [vmem:[%s2565_s3] sm:$0xff] (!%p1684_p2)  }
  0x23   : > { %s379_s25 = sadd.s32 %s1678_s24, %s377_s23  ;;  %s373_s23 = scalar_lea.vmem [#allocation6], %s2301_s16  ;;  %1779 = vmatprep.subr.bf16.mxu0 (!%p1684_p2), %v2157_v0  ;;  %648 = vst.msk [vmem:[#allocation3] sm:$0xff] (!%p1684_p2), %vm647_vm0, %v2158_v1  ;;  %649 = vst.msk [vmem:[#allocation3 + $0x8] sm:$0xff] (!%p1684_p2), %vm647_vm0, %v2158_v1  ;;  %1787 = vmatprep.subr.bf16.mxu1 (!%p1684_p2), %v2157_v0  ;;  %v2006_v3 = vld [vmem:[%s2565_s3 + $0x10] sm:$0xff] (!%p1684_p2)   ;;  %vm2159_vm2 = vmmov (!%p1684_p2), 0   ;;  %v2007_v4 = vld [vmem:[%s2565_s3 + $0x8] sm:$0xff] (!%p1684_p2)  }
  0x24   : > { %s1679_s19 = sshll.u32 %s379_s25, 2  ;;  %402 = sbr.rel (%p1684_p2) target bundleno = 267 (0x10b), region = 56  ;;  %650 = vst.msk [vmem:[#allocation3 + $0x10] sm:$0xff] (!%p1684_p2), %vm647_vm0, %v2158_v1  ;;  %651 = vst.msk [vmem:[#allocation3 + $0x18] sm:$0xff] (!%p1684_p2), %vm647_vm0, %v2158_v1  ;;  %1783 = vmatprep.mubr.msk.bf16.mxu0 (!%p1684_p2), %vm2159_vm2, %v2157_v0  ;;  %1791 = vmatprep.mubr.msk.bf16.mxu1 (!%p1684_p2), %vm2159_vm2, %v2157_v0  ;;  %v2008_v5 = vld [vmem:[%s2565_s3 + $0x18] sm:$0xff] (!%p1684_p2)   ;;  %vm420_vm3 = vcmask (!%p1684_p2), 261120  }
  0x25   : > { %s2310_s13 = scalar_lea.vmem %s2562_s0, %s1679_s19  ;;  %652 = vst.msk [vmem:[#allocation4] sm:$0xff] (!%p1684_p2), %vm647_vm0, %v2157_v0  ;;  %653 = vst.msk [vmem:[#allocation4 + $0x8] sm:$0xff] (!%p1684_p2), %vm647_vm0, %v2157_v0  ;;  %1780 = vmatpush3.bf16.msra.mxu0 (!%p1684_p2), %v2005_v2  ;;  %1788 = vmatpush3.bf16.msra.mxu1 (!%p1684_p2), %v2006_v3  ;;  %v2009_v7 = vld [vmem:[%s2565_s3 + $0x20] sm:$0xff] (!%p1684_p2)   ;;  %v2010_v8 = vld [vmem:[%s2565_s3 + $0x30] sm:$0xff] (!%p1684_p2)   ;;  %vm465_vm4 = vcmask (!%p1684_p2), 60416  }
  0x26   : > { %s385_s12 = scalar_select %p384_p1, %s2131_s30, 1 }
  0x27   : > { %654 = vst.msk [vmem:[#allocation4 + $0x10] sm:$0xff] (!%p1684_p2), %vm647_vm0, %v2157_v0  ;;  %655 = vst.msk [vmem:[#allocation4 + $0x18] sm:$0xff] (!%p1684_p2), %vm647_vm0, %v2157_v0  ;;  %1781 = vmatprep.subr.bf16.mxu0 (!%p1684_p2), %v2157_v0  ;;  %1789 = vmatprep.subr.bf16.mxu1 (!%p1684_p2), %v2157_v0  ;;  %v403_v6 = vld [vmem:[%s2310_s13] sm:$0xf] (!%p1684_p2)  ;;  %v2011_v9 = vld [vmem:[%s2565_s3 + $0x28] sm:$0xff] (!%p1684_p2)  }
  0x28   : > { %s387_s11 = sadd.s32 %s1678_s24, %s385_s12  ;;  %657 = vst.msk [vmem:[#allocation5] sm:$0xff] (!%p1684_p2), %vm656_vm1, %v2157_v0  ;;  %658 = vst.msk [vmem:[#allocation5 + $0x8] sm:$0xff] (!%p1684_p2), %vm656_vm1, %v2157_v0  ;;  %v2012_v10 = vld [vmem:[%s2565_s3 + $0x38] sm:$0xff] (!%p1684_p2)  }
  0x29   : > { %s1681_s26 = sshll.u32 %s387_s11, 2  ;;  %659 = vst.msk [vmem:[#allocation5 + $0x10] sm:$0xff] (!%p1684_p2), %vm656_vm1, %v2157_v0  ;;  %660 = vst.msk [vmem:[#allocation5 + $0x18] sm:$0xff] (!%p1684_p2), %vm656_vm1, %v2157_v0  ;;  %1782 = vmatpush3.bf16.msra.mxu0 (!%p1684_p2), %v2007_v4  ;;  %1790 = vmatpush3.bf16.msra.mxu1 (!%p1684_p2), %v2008_v5 }
  0x2a   : > { %s2316_s15 = scalar_lea.vmem %s2563_s1, %s1681_s26  ;;  %s2321_s22 = scalar_lea.vmem %s2564_s2, %s1681_s26  ;;  %1795 = vmatprep.subr.bf16.mxu0 (!%p1684_p2), %v2157_v0  ;;  %1803 = vmatprep.subr.bf16.mxu1 (!%p1684_p2), %v2157_v0 }
  0x2c   : > { %1784 = vmatmul.mubr.msk.bf16.vlgmr.msra.gmra.mrb[0].mxu0 %vm420_vm3, %v403_v6  ;;  %1792 = vmatmul.mubr.msk.bf16.vlgmr.msra.gmra.mrb[0].mxu1 %vm420_vm3, %v403_v6 }
  0x2d   : > { %1796 = vmatpush3.bf16.msra.mxu0 %v2009_v7  ;;  %1804 = vmatpush3.bf16.msra.mxu1 %v2010_v8 }
  0x2e   : > { %1797 = vmatprep.subr.bf16.mxu0 %v2157_v0  ;;  %1805 = vmatprep.subr.bf16.mxu1 %v2157_v0 }
  0x2f   : > { %1799 = vmatprep.mubr.msk.bf16.mxu0 %vm2159_vm2, %v2157_v0  ;;  %1807 = vmatprep.mubr.msk.bf16.mxu1 %vm2159_vm2, %v2157_v0 }
  0x31   : > { %1798 = vmatpush3.bf16.msra.mxu0 %v2011_v9  ;;  %1806 = vmatpush3.bf16.msra.mxu1 %v2012_v10 }
  0x34   : > { %1800 = vmatmul.mubr.msk.bf16.vlgmr.msra.gmra.mrb[4].mxu0 %vm420_vm3, %v403_v6  ;;  %1808 = vmatmul.mubr.msk.bf16.vlgmr.msra.gmra.mrb[4].mxu1 %vm420_vm3, %v403_v6 }
  0xff   : > { %v458_v11 = vpop.f32.mrb[0].mxu0  ;;  %v518_v13 = vpop.f32.mrb[0].mxu1 }
 0x100   : > { %v464_v12 = vpack.c.bf16 %v458_v11, %v458_v11  ;;  %v1785_v14 = vpop.f32.mrb[1].mxu0  ;;  %v524_v15 = vpack.c.bf16 %v518_v13, %v518_v13  ;;  %v1793_v16 = vpop.f32.mrb[1].mxu1 }
 0x101   : > { %v461_v17 = vpop.f32.mrb[2].mxu0  ;;  %v521_v18 = vpop.f32.mrb[2].mxu1 }
 0x102   : > { %466 = vst.msk [vmem:[#allocation2] sm:$0xf] %vm465_vm4, %v464_v12  ;;  %v1786_v19 = vpop.f32.mrb[3].mxu0  ;;  %526 = vst.msk [vmem:[#allocation2 + $0x4] sm:$0xf] %vm465_vm4, %v524_v15  ;;  %v1794_v20 = vpop.f32.mrb[3].mxu1 }
 0x107   : > { %v578_v21 = vpop.f32.mrb[4].mxu0  ;;  %v638_v23 = vpop.f32.mrb[4].mxu1 }
 0x108   : > { %v584_v22 = vpack.c.bf16 %v578_v21, %v578_v21  ;;  %v1801_v24 = vpop.f32.mrb[5].mxu0  ;;  %v644_v25 = vpack.c.bf16 %v638_v23, %v638_v23  ;;  %v1809_v26 = vpop.f32.mrb[5].mxu1 }
 0x109   : > { %v581_v27 = vpop.f32.mrb[6].mxu0  ;;  %v641_v28 = vpop.f32.mrb[6].mxu1 }
 0x10a   : > { %586 = vst.msk [vmem:[#allocation2 + $0x8] sm:$0xf] %vm465_vm4, %v584_v22  ;;  %v1802_v29 = vpop.f32.mrb[7].mxu0  ;;  %646 = vst.msk [vmem:[#allocation2 + $0xc] sm:$0xf] %vm465_vm4, %v644_v25  ;;  %v1810_v30 = vpop.f32.mrb[7].mxu1 }
 0x10b PF: > { %v2015_v31 = vld [vmem:[%s2566_s4] sm:$0xff]   ;;  %v2160_v32 = vmov 0.0   ;;  %v2016_v33 = vld [vmem:[%s2566_s4 + $0x8] sm:$0xff]   ;;  %vm2161_vm5 = vmmov 0   ;;  %vm678_vm6 = vcmask 261120   ;;  %vm785_vm7 = vcmask 64512  }
 0x10c   : > { %1811 = vmatprep.subr.bf16.mxu0 %v2160_v32  ;;  %1819 = vmatprep.subr.bf16.mxu1 %v2160_v32  ;;  %v661_v34 = vld [vmem:[%s2316_s15] sm:$0xf]  ;;  %v915_v42 = vld [vmem:[#allocation2 + $0x4] sm:$0xf]  ;;  %v2018_v46 = vld [vmem:[%s2567_s5 + $0x8] sm:$0xff]   ;;  %v2162_v61 = vmov 0  }
 0x10d   : > { %1812 = vmatpush3.bf16.msra.mxu0 %v2015_v31  ;;  %1815 = vmatprep.mubr.msk.bf16.mxu0 %vm2161_vm5, %v2160_v32  ;;  %v784_v41 = vld [vmem:[#allocation2] sm:$0xf]  ;;  %v832_v5 = vld [vmem:[#allocation3] sm:$0xff]  ;;  %vm854_vm8 = vcmask 7168   ;;  %v960_v10 = vld [vmem:[#allocation3 + $0x8] sm:$0xff]  ;;  %vm867_vm9 = vcmask 1043456  }
 0x10e   : > { %1813 = vmatprep.subr.bf16.mxu0 %v2160_v32  ;;  %1823 = vmatprep.mubr.msk.bf16.mxu1 %vm2161_vm5, %v2160_v32  ;;  %v2017_v45 = vld [vmem:[%s2567_s5] sm:$0xff]   ;;  %v1210_v27 = vld [vmem:[#allocation3 + $0x18] sm:$0xff]  ;;  %p1723_p3 = scmp.ne.s32.totalorder %s2131_s30, 1 }
 0x10f   : > { %1820 = vmatpush3.bf16.msra.mxu1 %v2017_v45  ;;  %v723_v47 = vld [vmem:[%s2321_s22] sm:$0xf]  ;;  %2013 = vset.pattern.permute.xlu0 %v2162_v61  ;;  %vm2165_vm10 = vmmov (!%p1723_p3), 0  }
 0x110   : > { %1821 = vmatprep.subr.bf16.mxu1 %v2160_v32  ;;  %2014 = vset.pattern.permute.xlu1 %v2162_v61  ;;  %v1085_v20 = vld [vmem:[#allocation3 + $0x10] sm:$0xff]  ;;  %v848_v61 = vld [vmem:[#allocation4] sm:$0xff] }
 0x111   : > { %1814 = vmatpush3.bf16.msra.mxu0 %v2016_v33  ;;  %v1040_v43 = vld [vmem:[#allocation2 + $0x8] sm:$0xf]  ;;  %v1165_v44 = vld [vmem:[#allocation2 + $0xc] sm:$0xf] }
 0x112   : > { %1827 = vmatprep.subr.bf16.mxu0 %v2160_v32 }
 0x113   : > { %1822 = vmatpush3.bf16.msra.mxu1 %v2018_v46 }
 0x114   : > { %1816 = vmatmul.mubr.msk.bf16.vlgmr.msra.gmra.mrb[0].mxu0 %vm678_vm6, %v661_v34  ;;  %1833 = vmatprep.subr.bf16.mxu1 %v2160_v32 }
 0x115   : > { %1829 = vmatprep.mubr.msk.bf16.mxu0 %vm2161_vm5, %v2160_v32 }
 0x116   : > { %1824 = vmatmul.mubr.msk.bf16.vlgmr.msra.gmra.mrb[0].mxu1 %vm678_vm6, %v723_v47 }
 0x117   : > { %1835 = vmatprep.mubr.msk.bf16.mxu1 %vm2161_vm5, %v2160_v32 }
 0x1e7   : > { %v716_v35 = vpop.f32.mrb[0].mxu0 }
 0x1e8   : > { %v722_v36 = vpack.c.bf16 %v716_v35, %v716_v35  ;;  %v1817_v37 = vpop.f32.mrb[1].mxu0 }
 0x1e9   : > { %v719_v38 = vpop.f32.mrb[2].mxu0  ;;  %v777_v11 = vpop.f32.mrb[0].mxu1 }
 0x1ea   : > { %v790_v39 = vsel %vm785_vm7, %v722_v36, 0  ;;  %v1818_v40 = vpop.f32.mrb[3].mxu0  ;;  %v783_v13 = vpack.c.bf16 %v777_v11, %v777_v11  ;;  %v1825_v14 = vpop.f32.mrb[1].mxu1 }
 0x1eb   : > { %1828 = vmatpush3.bf16.xpose.msra.mxu0 %v790_v39  ;;  %v780_v16 = vpop.f32.mrb[2].mxu1  ;;  %v856_v14 = vld [vmem:[#allocation5] sm:$0xff] }
 0x1ec   : > { %1839 = vmatprep.subr.bf16.mxu0 %v2160_v32  ;;  %v2424_v17 = vsel %vm867_vm9, %v783_v13, 0  ;;  %v1826_v18 = vpop.f32.mrb[3].mxu1 }
 0x1ed   : > { %1834 = vmatpush3.bf16.msra.mxu1 %v2424_v17 }
 0x1ee   : > { %1845 = vmatprep.subr.bf16.mxu1 %v2160_v32 }
 0x1f2   : > { %1830 = vmatmul.mubr.msk.bf16.vlgmr.msra.gmra.mrb[4].mxu0 %vm785_vm7, %v784_v41 }
 0x1f3   : > { %1840 = vmatpush3.bf16.xpose.msra.mxu0 %v790_v39  ;;  %1841 = vmatprep.mubr.msk.bf16.mxu0 %vm2161_vm5, %v2160_v32 }
 0x1f4   : > { %1851 = vmatprep.subr.bf16.mxu0 %v2160_v32 }
 0x1fa   : > { %1842 = vmatmul.mubr.msk.bf16.vlgmr.msra.gmra.mrb[8].mxu0 %vm785_vm7, %v915_v42 }
 0x1fb   : > { %1852 = vmatpush3.bf16.xpose.msra.mxu0 %v790_v39  ;;  %1853 = vmatprep.mubr.msk.bf16.mxu0 %vm2161_vm5, %v2160_v32 }
 0x1fc   : > { %1863 = vmatprep.subr.bf16.mxu0 %v2160_v32 }
 0x202   : > { %1854 = vmatmul.mubr.msk.bf16.vlgmr.msra.gmra.mrb[12].mxu0 %vm785_vm7, %v1040_v43 }
 0x203   : > { %1864 = vmatpush3.bf16.xpose.msra.mxu0 %v790_v39  ;;  %1865 = vmatprep.mubr.msk.bf16.mxu0 %vm2161_vm5, %v2160_v32 }
 0x20a   : > { %1866 = vmatmul.mubr.msk.bf16.vlgmr.msra.gmra.mrb[16].mxu0 %vm785_vm7, %v1165_v44 }
 0x2c5   : > { %v2406_v48 = vpop.f32.mrb[4].mxu0 }
 0x2c6   : > { %v1831_v49 = vpop.f32.mrb[5].mxu0  ;;  %v833_v50 = vsel %vm785_vm7, %v2406_v48, -inf }
 0x2c7   : > { %834 = vmax.xlane.f32.xlu0 %v833_v50  ;;  %v829_v51 = vpop.f32.mrb[6].mxu0 }
 0x2c8   : > { %v1832_v52 = vpop.f32.mrb[7].mxu0 }
 0x2cd   : > { %v2410_v53 = vpop.f32.mrb[8].mxu0 }
 0x2ce   : > { %v1843_v54 = vpop.f32.mrb[9].mxu0  ;;  %v961_v55 = vsel %vm785_vm7, %v2410_v53, -inf }
 0x2cf   : > { %962 = vmax.xlane.f32.xlu0 %v961_v55  ;;  %v956_v56 = vpop.f32.mrb[10].mxu0 }
 0x2d0   : > { %v1844_v57 = vpop.f32.mrb[11].mxu0 }
 0x2d5   : > { %v2414_v58 = vpop.f32.mrb[12].mxu0 }
 0x2d6   : > { %v1855_v59 = vpop.f32.mrb[13].mxu0  ;;  %v1086_v60 = vsel %vm785_vm7, %v2414_v58, -inf }
 0x2d7   : > { %1087 = vmax.xlane.f32.xlu1 %v1086_v60  ;;  %v1081_v62 = vpop.f32.mrb[14].mxu0 }
 0x2d8   : > { %v1856_v63 = vpop.f32.mrb[15].mxu0 }
 0x2dd   : > { %v2418_v0 = vpop.f32.mrb[16].mxu0 }
 0x2de   : > { %v1867_v1 = vpop.f32.mrb[17].mxu0  ;;  %v1211_v2 = vsel %vm785_vm7, %v2418_v0, -inf }
 0x2df   : > { %1212 = vmax.xlane.f32.xlu1 %v1211_v2  ;;  %v1206_v3 = vpop.f32.mrb[18].mxu0  ;;  %v977_v2 = vld [vmem:[#allocation4 + $0x8] sm:$0xff] }
 0x2e0   : > { %v1868_v4 = vpop.f32.mrb[19].mxu0 }
 0x354   : > { %v835_v6 = vpop.xlane.xlu0 %834 }
 0x355   : > { %v836_v7 = vmax.f32 %v832_v5, %v835_v6  ;;  %v1102_v6 = vld [vmem:[#allocation4 + $0x10] sm:$0xff] }
 0x357   : > { %v837_v8 = vsub.f32 %v832_v5, %v836_v7  ;;  %913 = vst.msk [vmem:[#allocation3] sm:$0xff] %vm854_vm8, %v836_v7  ;;  %842 = vperm.xlu0 %2013, %v836_v7  }
 0x359   : > { %v838_v9 = vmul.f32 1.442695, %v837_v8 }
 0x35b   : > { %2019 = vpow2.f32 %v838_v9 }
 0x35c   : > { %v963_v12 = vpop.xlane.xlu0 %962 }
 0x35d   : > { %v964_v15 = vmax.f32 %v960_v10, %v963_v12 }
 0x35f   : > { %1038 = vst.msk [vmem:[#allocation3 + $0x8] sm:$0xff] %vm854_vm8, %v964_v15  ;;  %970 = vperm.xlu1 %2014, %v964_v15   ;;  %v965_v19 = vsub.f32 %v960_v10, %v964_v15  ;;  %v1227_v10 = vld [vmem:[#allocation4 + $0x18] sm:$0xff] }
 0x361   : > { %v966_v21 = vmul.f32 1.442695, %v965_v19 }
 0x363   : > { %2021 = vpow2.f32 %v966_v21  ;;  %v985_v21 = vld [vmem:[#allocation5 + $0x8] sm:$0xff] }
 0x364   : > { %v1088_v22 = vpop.xlane.xlu1 %1087 }
 0x365   : > { %v2429_v23 = vpop.eup %2019  ;;  %v1089_v24 = vmax.f32 %v1085_v20, %v1088_v22 }
 0x366   : > { %859 = vperm.xlu0 %2013, %v2429_v23   ;;  %v849_v62 = vmul.f32 %v2429_v23, %v848_v61 }
 0x367   : > { %v1090_v25 = vsub.f32 %v1085_v20, %v1089_v24  ;;  %1163 = vst.msk [vmem:[#allocation3 + $0x10] sm:$0xff] %vm854_vm8, %v1089_v24  ;;  %1095 = vperm.xlu1 %2014, %v1089_v24  }
 0x369   : > { %v1091_v26 = vmul.f32 1.442695, %v1090_v25 }
 0x36b   : > { %2023 = vpow2.f32 %v1091_v26 }
 0x36c   : > { %v1213_v28 = vpop.xlane.xlu1 %1212 }
 0x36d   : > { %v1214_v29 = vmax.f32 %v1210_v27, %v1213_v28  ;;  %v2022_v31 = vpop.eup %2021  ;;  %v1110_v28 = vld [vmem:[#allocation5 + $0x10] sm:$0xff] }
 0x36e   : > { %v978_v3 = vmul.f32 %v2022_v31, %v977_v2 }
 0x36f   : > { %v1215_v30 = vsub.f32 %v1210_v27, %v1214_v29  ;;  %1288 = vst.msk [vmem:[#allocation3 + $0x18] sm:$0xff] %vm854_vm8, %v1214_v29  ;;  %1220 = vperm.xlu1 %2014, %v1214_v29  }
 0x371   : > { %v1216_v55 = vmul.f32 1.442695, %v1215_v30 }
 0x373   : > { %988 = vperm.xlu1 %2014, %v2022_v31  }
 0x375   : > { %v2434_v33 = vpop.eup %2023 }
 0x376   : > { %1113 = vperm.xlu0 %2013, %v2434_v33   ;;  %v1103_v7 = vmul.f32 %v2434_v33, %v1102_v6 }
 0x3d6   : > { %v843_v34 = vpop.permute.xlu0 %842 }
 0x3d7   : > { %v845_v35 = vsub.f32 %v2406_v48, %v843_v34 }
 0x3d9   : > { %v846_v36 = vmul.f32 1.442695, %v845_v35 }
 0x3db   : > { %2025 = vpow2.f32 %v846_v36  ;;  %v1235_v36 = vld [vmem:[#allocation5 + $0x18] sm:$0xff] }
 0x3de   : > { %v971_v37 = vpop.permute.xlu1 %970 }
 0x3df   : > { %v973_v38 = vsub.f32 %v2410_v53, %v971_v37 }
 0x3e1   : > { %v974_v39 = vmul.f32 1.442695, %v973_v38 }
 0x3e3   : > { %2027 = vpow2.f32 %v974_v39 }
 0x3e5   : > { %v2026_v40 = vpop.eup %2025  ;;  %v860_v63 = vpop.permute.xlu0 %859 }
 0x3e6   : > { %v1096_v41 = vpop.permute.xlu1 %1095  ;;  %v850_v42 = vsel %vm785_vm7, %v2026_v40, 0.0  ;;  %v863_v43 = vpack.c.bf16 %v2026_v40, %v2026_v40  ;;  %v862_v15 = vmul.f32 %v860_v63, %v856_v14 }
 0x3e7   : > { %v1098_v44 = vsub.f32 %v2414_v58, %v1096_v41  ;;  %851 = vadd.xlane.f32.xlu1 %v850_v42 }
 0x3e8   : > { %1836 = vmatmul.mubr.msk.bf16.vlgmr.msra.gmra.mrb[4].mxu1 %vm785_vm7, %v863_v43 }
 0x3e9   : > { %v1099_v45 = vmul.f32 1.442695, %v1098_v44  ;;  %1846 = vmatpush3.bf16.msra.mxu1 %v2424_v17  ;;  %1847 = vmatprep.mubr.msk.bf16.mxu1 %vm2161_vm5, %v2160_v32 }
 0x3ea   : > { %1857 = vmatprep.subr.bf16.mxu1 %v2160_v32 }
 0x3eb   : > { %2029 = vpow2.f32 %v1099_v45 }
 0x3ed   : > { %v2028_v46 = vpop.eup %2027 }
 0x3ee   : > { %v1221_v47 = vpop.permute.xlu1 %1220  ;;  %v979_v48 = vsel %vm785_vm7, %v2028_v46, 0.0  ;;  %v992_v49 = vpack.c.bf16 %v2028_v46, %v2028_v46 }
 0x3ef   : > { %v1223_v50 = vsub.f32 %v2418_v0, %v1221_v47  ;;  %980 = vadd.xlane.f32.xlu0 %v979_v48  ;;  %v2163_v47 = vmov (!%p1723_p3), 0  }
 0x3f0   : > { %1848 = vmatmul.mubr.msk.bf16.vlgmr.msra.gmra.mrb[8].mxu1 %vm785_vm7, %v992_v49  ;;  %2035 = vset.pattern.permute.xlu0 (!%p1723_p3), %v2163_v47 }
 0x3f1   : > { %v1224_v51 = vmul.f32 1.442695, %v1223_v50  ;;  %1858 = vmatpush3.bf16.msra.mxu1 %v2424_v17  ;;  %1859 = vmatprep.mubr.msk.bf16.mxu1 %vm2161_vm5, %v2160_v32  ;;  %v1310_v50 = vld [vmem:[%s2568_s6] sm:$0xf] (!%p1723_p3) }
 0x3f2   : > { %1869 = vmatprep.subr.bf16.mxu1 %v2160_v32  ;;  %v989_v60 = vpop.permute.xlu1 %988 }
 0x3f3   : > { %2031 = vpow2.f32 %v1224_v51  ;;  %v991_v22 = vmul.f32 %v989_v60, %v985_v21  ;;  %v1726_v60 = vld [vmem:[%s2568_s6 + $0x4] sm:$0xf] (!%p1723_p3) }
 0x3f4   : > { %2033 = vpow2.f32 %v1216_v55 }
 0x3f5   : > { %v2030_v52 = vpop.eup %2029 }
 0x3f6   : > { %v1104_v53 = vsel %vm785_vm7, %v2030_v52, 0.0  ;;  %v1117_v54 = vpack.c.bf16 %v2030_v52, %v2030_v52  ;;  %v2164_v52 = vmov (!%p1723_p3), 0.0  }
 0x3f7   : > { %1105 = vadd.xlane.f32.xlu1 %v1104_v53  ;;  %v1315_v53 = vsel (!%p1723_p3), %vm867_vm9, %v1310_v50, 0  ;;  %1887 = vmatprep.subr.bf16.mxu0 (!%p1723_p3), %v2164_v52 }
 0x3f8   : > { %1860 = vmatmul.mubr.msk.bf16.vlgmr.msra.gmra.mrb[12].mxu1 %vm785_vm7, %v1117_v54  ;;  %1889 = vmatprep.mubr.msk.bf16.mxu0 (!%p1723_p3), %vm2165_vm10, %v2164_v52 }
 0x3f9   : > { %1870 = vmatpush3.bf16.msra.mxu1 %v2424_v17  ;;  %1871 = vmatprep.mubr.msk.bf16.mxu1 %vm2161_vm5, %v2160_v32  ;;  %v1114_v32 = vpop.permute.xlu0 %1113 }
 0x3fa   : > { %v1116_v29 = vmul.f32 %v1114_v32, %v1110_v28  ;;  %1875 = vmatprep.subr.bf16.mxu1 (!%p1723_p3), %v2164_v52  ;;  %v1730_v32 = vld [vmem:[%s2568_s6 + $0xc] sm:$0xf] (!%p1723_p3) }
 0x3fb   : > { %v1492_v6 = vsel (!%p1723_p3), %vm867_vm9, %v1730_v32, 0 }
 0x3fd   : > { %v2032_v56 = vpop.eup %2031 }
 0x3fe   : > { %v1229_v57 = vsel %vm785_vm7, %v2032_v56, 0.0  ;;  %v1242_v58 = vpack.c.bf16 %v2032_v56, %v2032_v56  ;;  %v2034_v59 = vpop.eup %2033  ;;  %v1728_v56 = vld [vmem:[%s2568_s6 + $0x8] sm:$0xf] (!%p1723_p3) }
 0x3ff   : > { %1230 = vadd.xlane.f32.xlu0 %v1229_v57  ;;  %v1228_v11 = vmul.f32 %v2034_v59, %v1227_v10  ;;  %v1433_v57 = vsel (!%p1723_p3), %vm867_vm9, %v1728_v56, 0 }
 0x400   : > { %1872 = vmatmul.mubr.msk.bf16.vlgmr.msra.gmra.mrb[16].mxu1 %vm785_vm7, %v1242_v58  ;;  %1888 = vmatpush3.bf16.msra.mxu0 (!%p1723_p3), %v1433_v57 }
 0x401   : > { %1876 = vmatpush3.bf16.msra.mxu1 (!%p1723_p3), %v1315_v53  ;;  %1877 = vmatprep.mubr.msk.bf16.mxu1 (!%p1723_p3), %vm2165_vm10, %v2164_v52 }
 0x402   : > { %1881 = vmatprep.subr.bf16.mxu1 (!%p1723_p3), %v2164_v52  ;;  %1893 = vmatprep.subr.bf16.mxu0 (!%p1723_p3), %v2164_v52 }
 0x408   : > { %1238 = vperm.xlu1 %2014, %v2034_v59  }
 0x40c   : > { %2036 = vset.pattern.permute.xlu1 (!%p1723_p3), %v2163_v47 }
 0x474   : > { %v852_v0 = vpop.xlane.xlu1 %851 }
 0x475   : > { %v853_v1 = vadd.f32 %v852_v0, %v849_v62  ;;  %v1374_v0 = vsel (!%p1723_p3), %vm867_vm9, %v1726_v60, 0 }
 0x477   : > { %855 = vst.msk [vmem:[#allocation4] sm:$0xff] %vm854_vm8, %v853_v1 }
 0x47c   : > { %v981_v4 = vpop.xlane.xlu0 %980 }
 0x47d   : > { %v982_v5 = vadd.f32 %v981_v4, %v978_v3 }
 0x47e   : > { %v1301_v44 = vld [vmem:[#allocation4] sm:$0xff] (!%p1723_p3) }
 0x47f   : > { %983 = vst.msk [vmem:[#allocation4 + $0x8] sm:$0xff] %vm854_vm8, %v982_v5  ;;  %2037 = vrcp.f32 (!%p1723_p3), %v1301_v44 }
 0x484   : > { %v1106_v8 = vpop.xlane.xlu1 %1105 }
 0x485   : > { %v1107_v9 = vadd.f32 %v1106_v8, %v1103_v7 }
 0x486   : > { %v1359_v46 = vld [vmem:[#allocation4 + $0x8] sm:$0xff] (!%p1723_p3) }
 0x487   : > { %1108 = vst.msk [vmem:[#allocation4 + $0x10] sm:$0xff] %vm854_vm8, %v1107_v9 }
 0x488   : > { %v1239_v37 = vpop.permute.xlu1 %1238 }
 0x489   : > { %v1241_v38 = vmul.f32 %v1239_v37, %v1235_v36  ;;  %v2038_v49 = vpop.eup (!%p1723_p3), %2037 }
 0x48a   : > { %1305 = vperm.xlu0 (!%p1723_p3), %2035, %v2038_v49  }
 0x48c   : > { %v1231_v12 = vpop.xlane.xlu0 %1230 }
 0x48d   : > { %v1232_v13 = vadd.f32 %v1231_v12, %v1228_v11 }
 0x48e   : > { %v1418_v45 = vld [vmem:[#allocation4 + $0x10] sm:$0xff] (!%p1723_p3) }
 0x48f   : > { %1233 = vst.msk [vmem:[#allocation4 + $0x18] sm:$0xff] %vm854_vm8, %v1232_v13  ;;  %2039 = vrcp.f32 (!%p1723_p3), %v1418_v45  ;;  %v1724_v13 = vld [vmem:[%s2569_s7] ss:$0 sm:$0xff] (!%p1723_p3) }
 0x490   : > { %2041 = vrcp.f32 (!%p1723_p3), %v1359_v46 }
 0x496   : > { %v1477_v48 = vld [vmem:[#allocation4 + $0x18] sm:$0xff] (!%p1723_p3) }
 0x497   : > { %2043 = vrcp.f32 (!%p1723_p3), %v1477_v48 }
 0x499   : > { %v2040_v51 = vpop.eup (!%p1723_p3), %2039 }
 0x49a   : > { %v2042_v54 = vpop.eup (!%p1723_p3), %2041  ;;  %1422 = vperm.xlu0 (!%p1723_p3), %2035, %v2040_v51  }
 0x49b   : > { %1363 = vperm.xlu1 (!%p1723_p3), %2036, %v2042_v54  }
 0x4a1   : > { %v2044_v55 = vpop.eup (!%p1723_p3), %2043 }
 0x4a2   : > { %1481 = vperm.xlu1 (!%p1723_p3), %2036, %v2044_v55  }
 0x4bb   : > { %v905_v16 = vpop.f32.mrb[4].mxu1 }
 0x4bc   : > { %v911_v17 = vadd.f32 %v905_v16, %v862_v15  ;;  %v1837_v18 = vpop.f32.mrb[5].mxu1 }
 0x4bd   : > { %v908_v19 = vpop.f32.mrb[6].mxu1 }
 0x4be   : > { %912 = vst.msk [vmem:[#allocation5] sm:$0xff] %vm785_vm7, %v911_v17  ;;  %v1838_v20 = vpop.f32.mrb[7].mxu1 }
 0x4c3   : > { %v1030_v23 = vpop.f32.mrb[8].mxu1 }
 0x4c4   : > { %v1036_v24 = vadd.f32 %v1030_v23, %v991_v22  ;;  %v1849_v25 = vpop.f32.mrb[9].mxu1 }
 0x4c5   : > { %v1033_v26 = vpop.f32.mrb[10].mxu1  ;;  %v1300_v58 = vld [vmem:[#allocation5] sm:$0xff] (!%p1723_p3) }
 0x4c6   : > { %1037 = vst.msk [vmem:[#allocation5 + $0x8] sm:$0xff] %vm785_vm7, %v1036_v24  ;;  %v1850_v27 = vpop.f32.mrb[11].mxu1 }
 0x4cb   : > { %v1155_v30 = vpop.f32.mrb[12].mxu1 }
 0x4cc   : > { %v1161_v31 = vadd.f32 %v1155_v30, %v1116_v29  ;;  %v1861_v33 = vpop.f32.mrb[13].mxu1 }
 0x4cd   : > { %v1158_v34 = vpop.f32.mrb[14].mxu1  ;;  %v1358_v3 = vld [vmem:[#allocation5 + $0x8] sm:$0xff] (!%p1723_p3) }
 0x4ce   : > { %1162 = vst.msk [vmem:[#allocation5 + $0x10] sm:$0xff] %vm785_vm7, %v1161_v31  ;;  %v1862_v35 = vpop.f32.mrb[15].mxu1 }
 0x4d0   : > { %1292 = sbr.rel (%p1723_p3) target bundleno = 1537 (0x601), region = 60 }
 0x4d3   : > { %v1280_v39 = vpop.f32.mrb[16].mxu1 }
 0x4d4   : > { %v1286_v40 = vadd.f32 %v1280_v39, %v1241_v38  ;;  %v1873_v41 = vpop.f32.mrb[17].mxu1 }
 0x4d5   : > { %v1283_v42 = vpop.f32.mrb[18].mxu1  ;;  %v1417_v62 = vld [vmem:[#allocation5 + $0x10] sm:$0xff] (!%p1723_p3) }
 0x4d6   : > { %1287 = vst.msk [vmem:[#allocation5 + $0x18] sm:$0xff] %vm785_vm7, %v1286_v40  ;;  %v1874_v43 = vpop.f32.mrb[19].mxu1 }
 0x4dd   : > { %v1476_v8 = vld [vmem:[#allocation5 + $0x18] sm:$0xff] }
 0x509   : > { %v1306_v59 = vpop.permute.xlu0 %1305 }
 0x50a   : > { %v1308_v61 = vmul.f32 %v1306_v59, %v1300_v58 }
 0x50c   : > { %v1309_v63 = vpack.c.bf16 %v1308_v61, %v1308_v61 }
 0x50e   : > { %1878 = vmatmul.mubr.msk.bf16.vlgmr.msra.gmra.mrb[0].mxu1 %vm785_vm7, %v1309_v63 }
 0x50f   : > { %1882 = vmatpush3.bf16.msra.mxu1 %v1374_v0  ;;  %1883 = vmatprep.mubr.msk.bf16.mxu1 %vm2165_vm10, %v2164_v52 }
 0x519   : > { %v1423_v1 = vpop.permute.xlu0 %1422 }
 0x51a   : > { %v1425_v2 = vmul.f32 %v1423_v1, %v1417_v62  ;;  %v1364_v4 = vpop.permute.xlu1 %1363 }
 0x51b   : > { %v1366_v7 = vmul.f32 %v1364_v4, %v1358_v3 }
 0x51c   : > { %v1426_v5 = vpack.c.bf16 %v1425_v2, %v1425_v2 }
 0x51d   : > { %v1367_v10 = vpack.c.bf16 %v1366_v7, %v1366_v7 }
 0x51e   : > { %1890 = vmatmul.mubr.msk.bf16.vlgmr.msra.gmra.mrb[0].mxu0 %vm785_vm7, %v1426_v5 }
 0x51f   : > { %1894 = vmatpush3.bf16.msra.mxu0 %v1492_v6  ;;  %1895 = vmatprep.mubr.msk.bf16.mxu0 %vm2165_vm10, %v2164_v52 }
 0x520   : > { %1884 = vmatmul.mubr.msk.bf16.vlgmr.msra.gmra.mrb[0].mxu1 %vm785_vm7, %v1367_v10 }
 0x521   : > { %v1482_v9 = vpop.permute.xlu1 %1481 }
 0x522   : > { %v1484_v11 = vmul.f32 %v1482_v9, %v1476_v8 }
 0x524   : > { %v1485_v12 = vpack.c.bf16 %v1484_v11, %v1484_v11 }
 0x52a   : > { %1896 = vmatmul.mubr.msk.bf16.vlgmr.msra.gmra.mrb[0].mxu0 %vm785_vm7, %v1485_v12 }
 0x5f3   : > { %v1410_v14 = vpop.f32.mrb[0].mxu1 }
 0x5f4   : > { %v1885_v15 = vpop.f32.mrb[1].mxu1  ;;  %v1899_v17 = vadd.f32 %v1724_v13, %v1410_v14 }
 0x5f5   : > { %v1413_v16 = vpop.f32.mrb[2].mxu1 }
 0x5f6   : > { %v1886_v18 = vpop.f32.mrb[3].mxu1 }
 0x5fd   : > { %v1528_v19 = vpop.f32.mrb[0].mxu0 }
 0x5fe   : > { %v1900_v20 = vadd.f32 %v1899_v17, %v1528_v19  ;;  %v1897_v21 = vpop.f32.mrb[1].mxu0 }
 0x5ff   : > { %v1531_v22 = vpop.f32.mrb[2].mxu0 }
 0x600   : > { %1535 = vst.msk [vmem:[%s373_s23] sm:$0xff] %vm678_vm6, %v1900_v20  ;;  %v1898_v23 = vpop.f32.mrb[3].mxu0 }
 0x601 PF: > { %s1733_s17 = sshll.u32 %s2139_s10, 1  ;;  %s1552_s15 = sshll.u32 %s373_s23, 4  ;;  %s2505_s15 = int_to_ptr.vmem [resolvable:$true] %s1552_s15 }
 0x602   : > { %s1548_s18 = sadd.s32 %s2135_s9, %s1733_s17  ;;  %s2595_s24 = sand.u32 1, %s2123_s28  }
 0x603   : > { %s1734_s19 = sshll.u32 %s1548_s18, 7  ;;  %s1537_s30 = scalar_lea.sflag [#allocation7], %s2595_s24 }
 0x604   : > { %s1550_s22 = scalar_lea.hbm %s2570_s8, %s1734_s19  ;;  %s2045_s25 = scalar_lea.vmem %s2505_s15, 128 }
 0x605   : > { %p2046_p4 = scmp.ne.s32.totalorder %s2505_s15, %s2045_s25  ;;  %s2166_s9 = smov [#allocation6]  }
 0x606   : > { %s2049_s10 = sshll.u32 %s2166_s9, 4  ;;  %s2050_s10 = int_to_ptr.vmem [resolvable:$false] %s2049_s10 }
 0x607   : > { %p2047_p5 = pnand %p2046_p4, %p2274_p6  ;;  %s2051_s16 = scalar_lea.vmem %s2050_s10, 256 }
 0x608   : > { %p2052_p9 = scmp.lt.s32.totalorder %s2505_s15, %s2050_s10  ;;  %p2053_p10 = scmp.lt.s32.totalorder %s2051_s16, %s2045_s25 }
 0x609   : > { %p2048_p8 = pneg %p2047_p5 }
 0x60a   : > { %p2054_p11 = por %p2053_p10, %p2052_p9 }
 0x60c   : > { %p2055_p12 = pnand %p2054_p11, %p2048_p8 }
 0x60e   : > { %2058 = shalt.err (!%p2055_p12)
}
 0x60f   : > { %s2059_s23 = scalar_lea.hbm %s1550_s22, 128  ;;  %s2063_s29 = scalar_lea.hbm %s2570_s8, 512 }
 0x610   : > { %p2060_p13 = scmp.ne.s32.totalorder %s1550_s22, %s2059_s23  ;;  %p2064_p2 = scmp.lt.u32.totalorder %s1550_s22, %s2570_s8 }
 0x611   : > { %p2065_p3 = scmp.lt.u32.totalorder %s2063_s29, %s2059_s23  ;;  %p2067_p5 = scmp.lt.u32.totalorder %s2059_s23, %s1550_s22 }
 0x612   : > { %p2061_p0 = pnand %p2060_p13, %p2274_p6 }
 0x613   : > { %p2066_p4 = por %p2065_p3, %p2064_p2 }
 0x614   : > { %p2062_p1 = pneg %p2061_p0 }
 0x615   : > { %p2068_p9 = por %p2067_p5, %p2066_p4 }
 0x617   : > { %p2069_p8 = pnand %p2068_p9, %p2062_p1 }
 0x619   : > { %2072 = shalt.err (!%p2069_p8)
}
 0x61a   : > { %1909 = dma.vmem_to_hbm [thread:$0]  (%p2274_p6), %s2505_s15, 128, %s1550_s22, %s1537_s30  }
 0x61b PF: > { %s2596_s14 = sld [smem:[#allocation14_spill]]  ;;  %s2597_s17 = sld [smem:[#allocation9_spill]] }
 0x621   : > { %p1915_p10 = scmp.ge.s32.totalorder %s2596_s14, 2  ;;  %s1564_s19 = sand.u32 1, %s2597_s17  }
 0x622   : > { %s1565_s21 = scalar_lea.sflag [#allocation7], %s1564_s19 }
 0x623   : > { %p1912_p11 = pnand %p1915_p10, %p2281_p7 }
 0x625   : > { %2114 = dma.done.wait (!%p1912_p11), %s1565_s21, 128  }
 0x626   : > { %2116 = vsyncadd (!%p1912_p11), %s1565_s21, 4294967168  ;;  %s21_s14 = sadd.s32 1, %s2596_s14   ;;  %s2599_s26 = sld [smem:[#allocation10_spill]] }
 0x627   : > { %p18_p12 = scmp.ge.s32.totalorder %s21_s14, 10   ;;  %s2600_s29 = sld [smem:[#allocation19_spill]] }
 0x628   : > { %s2601_s30 = sld [smem:[#allocation11_spill]]  ;;  %s2602_s9 = sld [smem:[#allocation12_spill]] }
 0x629   : > { %s2603_s10 = sld [smem:[#allocation13_spill]]  ;;  %s2604_s11 = sld [smem:[#allocation15_spill]] }
 0x62a   : > { %s2605_s12 = sld [smem:[#allocation16_spill]]  ;;  %s2606_s13 = sld [smem:[#allocation18_spill]] }
 0x62b   : > { %s2607_s27 = smov %s2123_s28  ;;  %20 = sbr.rel (!%p18_p12) target bundleno = 6 (0x6), region = 122 }
 0x62c   : > { %s2608_s28 = smov %s2599_s26 }
 0x632   :  { %1570 = vsyncpa [#allocation7], 1 }
 0x633   :  { %1572 = vsyncpa [#allocation7 + $0x1], 1 }

</bundles_post_ra>
